<compile_context>
chip_gen: v5e
topology: v5e:2x2
jax: 0.10.0
libtpu: 0.0.40
codegen_flags: <defaults>
</compile_context>

<pallas_src>
import jax
import jax.numpy as jnp
import numpy as np
from jax.experimental import pallas as pl
from jax.experimental.pallas import tpu as pltpu

LANE = 128
SUBLANE = 8


def _round_up(x, m):
    return (x + m - 1) // m * m


def _pad_axis(a, target, axis):
    pad = target - a.shape[axis]
    if pad == 0:
        return a
    widths = [(0, 0)] * a.ndim
    widths[axis] = (0, pad)
    return jnp.pad(a, widths)


def _default_num_batch_shards():
    """Batch shards: 2 only on dual-TensorCore chips (v7x); 1 elsewhere."""
    try:
        kind = jax.devices()[0].device_kind.lower().replace(" ", "")
    except Exception:  # pragma: no cover - no backend / CPU fallback
        return 1
    return 2 if ("v7" in kind or "tpu7" in kind) else 1


def _make_gru_kernel(*, T, Tc, n_chunks, Bs, Hp):
    """Build the kernel with static loop structure closed over Python ints."""
    Tp = n_chunks * Tc
    needs_mask = (Tp != T)          # padded tail timesteps must not update h
    CHUNK_ROWS = Tc * Bs
    bf16 = jnp.bfloat16

    def kernel(x_hbm, wih_ref, whh_ref, bihf_ref, bhn_ref, w2_ref, b2_ref,
               out_ref, xbuf, gxbuf, sem):
        """One batch shard: stream x chunks, run the T-step GRU recurrence.

        x_hbm    : (num_shards*n_chunks, Tc*Bs, Ep) bf16 HBM  (rows = (t,b))
        wih_ref  : (Ep, 3*Hp) bf16   W_ih^T (gate order r|z|n, padded to Hp)
        whh_ref  : (Hp, 3*Hp) bf16   W_hh^T
        bihf_ref : (1, 3*Hp)  f32    b_ih + [b_hh_r | b_hh_z | 0]  (folded)
        bhn_ref  : (1, Hp)    f32    b_hh_n (stays inside r*(...))
        w2_ref   : (Hp, Cp)   bf16   classifier weight^T
        b2_ref   : (1, Cp)    f32    classifier bias
        out_ref  : (Bs, Cp)   f32    logits for this batch shard
        xbuf     : (2, Tc*Bs, Ep)    bf16 VMEM  streamed x chunks
        gxbuf    : (2*Tc*Bs, 3*Hp)   f32  VMEM  double-buffered input gates
        sem      : DMA semaphores (2,)
        """
        b = pl.program_id(0)
        chunk0 = b * n_chunks        # first chunk index of this shard in HBM

        def start_fetch(k, slot):
            pltpu.make_async_copy(x_hbm.at[chunk0 + k], xbuf.at[slot],
                                  sem.at[slot]).start()

        def wait_fetch(slot):
            # src is a shape-matching placeholder; wait keys off (dst, sem).
            pltpu.make_async_copy(x_hbm.at[0], xbuf.at[slot],
                                  sem.at[slot]).wait()

        def gx_into(slot):
            # One (Tc*Bs, Ep) x (Ep, 3Hp) MXU matmul for a whole chunk of
            # timesteps (+ folded biases), amortized over Tc serial steps.
            gx = jnp.dot(xbuf[slot], wih_ref[...],
                         preferred_element_type=jnp.float32)
            gxbuf[pl.ds(slot * CHUNK_ROWS, CHUNK_ROWS), :] = gx + bihf_ref[...]

        # ---- Prologue: prime the x / gx pipeline ---------------------------
        start_fetch(0, 0)
        if n_chunks > 1:
            start_fetch(1, 1)
        wait_fetch(0)
        gx_into(0)

        bhn = jnp.broadcast_to(bhn_ref[...], (Bs, Hp))    # hoisted broadcast

        h0 = jnp.zeros((Bs, Hp), jnp.float32)
        carry0 = (h0, h0.astype(bf16))                    # (h_f32, h_bf16)

        def chunk_body(c, carry):
            slot = jax.lax.rem(c, 2)
            nslot = 1 - slot

            # Stage chunk c+1 ahead of its consumption: wait for its x DMA,
            # compute its input gates, and start the DMA for chunk c+2.
            # All independent of the recurrence below -> overlaps with it.
            @pl.when(c + 1 < n_chunks)
            def _():
                wait_fetch(nslot)
                gx_into(nslot)

                @pl.when(c + 2 < n_chunks)
                def _():
                    start_fetch(c + 2, slot)

            gx_base = slot * CHUNK_ROWS

            def step(t, hc):
                h, hb = hc            # f32 state + bf16 copy from last step
                gh = jnp.dot(hb, whh_ref[...],
                             preferred_element_type=jnp.float32)  # (Bs, 3Hp)
                row = pl.multiple_of(gx_base + t * Bs, SUBLANE)
                gxt = gxbuf[pl.ds(row, Bs), :]                    # (Bs, 3Hp)
                # PyTorch nn.GRU gate order r | z | n; 128-lane aligned.
                r = jax.nn.sigmoid(gxt[:, 0:Hp] + gh[:, 0:Hp])
                z = jax.nn.sigmoid(gxt[:, Hp:2 * Hp] + gh[:, Hp:2 * Hp])
                n = jnp.tanh(gxt[:, 2 * Hp:3 * Hp]
                             + r * (gh[:, 2 * Hp:3 * Hp] + bhn))
                h_new = (1.0 - z) * n + z * h
                if needs_mask:
                    valid = (c * Tc + t) < T      # padded tail step -> keep h
                    h_new = jnp.where(valid, h_new, h)
                # Cast for the NEXT step's matmul here (off the issue path).
                return (h_new, h_new.astype(bf16))

            return jax.lax.fori_loop(0, Tc, step, carry, unroll=min(Tc, 8))

        h_last, _ = jax.lax.fori_loop(0, n_chunks, chunk_body, carry0)

        # ---- Classifier on the last hidden state (lane-dense output) -------
        logits = jnp.dot(h_last.astype(w2_ref.dtype), w2_ref[...],
                         preferred_element_type=jnp.float32) + b2_ref[...]
        out_ref[...] = logits.astype(out_ref.dtype)

    return kernel


def gru_forward_pallas(x_tbe, w_ih, w_hh, b_ih, b_hh, w2, b2,
                       *, num_batch_shards=None, chunk_timesteps=16):
    """x_tbe: (T, B, E) f32 embeddings. Returns logits (B, C).

    num_batch_shards: None -> auto (2 on v7x dual-TC chips, 1 on v5e/v6e).
    chunk_timesteps : Tc, timesteps per streamed x / precomputed-gx chunk.
    """
    T, B, E = x_tbe.shape
    H = w_hh.shape[1]
    C = w2.shape[0]

    if num_batch_shards is None:
        num_batch_shards = _default_num_batch_shards()

    Hp = _round_up(H, LANE)
    Ep = _round_up(E, LANE)
    Cp = _round_up(C, LANE)
    Bp = _round_up(B, SUBLANE * num_batch_shards)
    Bs = Bp // num_batch_shards

    Tc = max(1, min(T, chunk_timesteps))
    Tp = _round_up(T, Tc)
    n_chunks = Tp // Tc

    f32, bf16 = jnp.float32, jnp.bfloat16

    # --- pad + transpose weights; each gate block (r|z|n) padded to Hp ------
    def pad_gate_rows(w):                       # (3H, X) -> (3Hp, X), zeros
        r_, z_, n_ = jnp.split(w, 3, axis=0)
        return jnp.concatenate([_pad_axis(g, Hp, 0) for g in (r_, z_, n_)],
                               axis=0)

    wih_p = _pad_axis(pad_gate_rows(w_ih), Ep, 1).T.astype(bf16)   # (Ep, 3Hp)
    whh_p = _pad_axis(pad_gate_rows(w_hh), Hp, 1).T.astype(bf16)   # (Hp, 3Hp)

    def pad_gate_vec(bvec):
        r_, z_, n_ = jnp.split(bvec, 3)
        return tuple(_pad_axis(g, Hp, 0) for g in (r_, z_, n_))

    bih_r, bih_z, bih_n = pad_gate_vec(b_ih.astype(f32))
    bhh_r, bhh_z, bhh_n = pad_gate_vec(b_hh.astype(f32))
    # Fold the r/z hidden biases into the precomputed input gates; the n-gate
    # hidden bias must stay inside r*(W_hn h + b_hn), so it is passed alone.
    bih_fold = jnp.concatenate([bih_r + bhh_r, bih_z + bhh_z, bih_n]
                               ).reshape(1, 3 * Hp)
    bhn = bhh_n.reshape(1, Hp)

    w2_p = _pad_axis(_pad_axis(w2, Cp, 0), Hp, 1).T.astype(bf16)   # (Hp, Cp)
    b2_p = _pad_axis(b2.astype(f32), Cp, 0).reshape(1, Cp)

    # --- activations: pad E->Ep, B->Bp, T->Tp (zero rows), order by shard ---
    # then by chunk so each (Tc*Bs, Ep) slab is one integer-indexed DMA.
    x_p = _pad_axis(_pad_axis(_pad_axis(x_tbe, Ep, 2), Bp, 1), Tp, 0)
    x_sh = (x_p.reshape(Tp, num_batch_shards, Bs, Ep)
               .transpose(1, 0, 2, 3)                       # (S, Tp, Bs, Ep)
               .reshape(num_batch_shards * n_chunks, Tc * Bs, Ep)
               .astype(bf16))

    kernel = _make_gru_kernel(T=T, Tc=Tc, n_chunks=n_chunks, Bs=Bs, Hp=Hp)

    grid_spec = pltpu.PrefetchScalarGridSpec(
        num_scalar_prefetch=0,
        grid=(num_batch_shards,),
        in_specs=[
            pl.BlockSpec(memory_space=pl.ANY),                   # x (HBM)
            pl.BlockSpec((Ep, 3 * Hp), lambda b: (0, 0)),        # W_ih^T
            pl.BlockSpec((Hp, 3 * Hp), lambda b: (0, 0)),        # W_hh^T
            pl.BlockSpec((1, 3 * Hp), lambda b: (0, 0)),         # folded bias
            pl.BlockSpec((1, Hp), lambda b: (0, 0)),             # b_hh_n
            pl.BlockSpec((Hp, Cp), lambda b: (0, 0)),            # W2^T
            pl.BlockSpec((1, Cp), lambda b: (0, 0)),             # b2
        ],
        out_specs=pl.BlockSpec((Bs, Cp), lambda b: (b, 0)),
        scratch_shapes=[
            pltpu.VMEM((2, Tc * Bs, Ep), bf16),        # streamed x chunks
            pltpu.VMEM((2 * Tc * Bs, 3 * Hp), f32),    # double-buffered gx
            pltpu.SemaphoreType.DMA((2,)),
        ],
    )

    # Explicit VMEM budget: double-buffered weights + streamed chunks + gx
    # scratch + output, with headroom; independent of T, well under 64 MiB.
    weight_bytes = 2 * ((Ep * 3 * Hp + Hp * 3 * Hp + Hp * Cp) * 2
                        + (4 * Hp + Cp) * 4)
    scratch_bytes = 2 * Tc * Bs * Ep * 2 + 2 * Tc * Bs * 3 * Hp * 4
    out_bytes = 2 * Bs * Cp * 4
    vmem_limit = int(1.5 * (weight_bytes + scratch_bytes + out_bytes)) + (8 << 20)
    vmem_limit = min(max(vmem_limit, 32 << 20), 64 << 20)

    out_p = pl.pallas_call(
        kernel,
        out_shape=jax.ShapeDtypeStruct((Bp, Cp), f32),
        grid_spec=grid_spec,
        compiler_params=pltpu.CompilerParams(
            # Batch shards are independent -> "parallel" (2 TCs on v7x);
            # the sequential T recurrence lives entirely inside the body.
            dimension_semantics=("parallel",),
            vmem_limit_bytes=vmem_limit,
        ),
    )(x_sh, wih_p, whh_p, bih_fold, bhn, w2_p, b2_p)

    return out_p[:B, :C]


def gru_forward_ref(x_tbe, w_ih, w_hh, b_ih, b_hh, w2, b2):
    """Pure-JAX f32 reference of the same forward pass (correctness check)."""
    T, B, E = x_tbe.shape
    H = w_hh.shape[1]
    h0 = jnp.zeros((B, H), jnp.float32)

    def step(h, x):
        gx = x @ w_ih.T + b_ih
        gh = h @ w_hh.T + b_hh
        r = jax.nn.sigmoid(gx[:, 0:H] + gh[:, 0:H])
        z = jax.nn.sigmoid(gx[:, H:2 * H] + gh[:, H:2 * H])
        n = jnp.tanh(gx[:, 2 * H:] + r * gh[:, 2 * H:])
        h_new = (1.0 - z) * n + z * h
        return h_new, None

    h_last, _ = jax.lax.scan(step, h0, x_tbe)
    return h_last @ w2.T + b2


if __name__ == "__main__":
    # Small shapes consistent with the module (scaled-down batch/vocab/seq).
    E = 100            # dim_embedding
    H = 40             # dim_hidden
    C = 20             # classes
    V = 500            # vocabulary_size (scaled down from 160792)

    root_key = jax.random.PRNGKey(0)

    def run_case(T, B, chunk_timesteps, case_idx):
        key = jax.random.fold_in(root_key, case_idx)
        (k_emb, k_ih, k_hh, k_bih, k_bhh,
         k_w2, k_b2, k_sent, k_lab) = jax.random.split(key, 9)

        # Deterministic parameter init (uniform, PyTorch-style scale).
        s = 1.0 / np.sqrt(H)
        emb_table = jax.random.normal(k_emb, (V, E), jnp.float32)
        w_ih = jax.random.uniform(k_ih, (3 * H, E), jnp.float32, -s, s)
        w_hh = jax.random.uniform(k_hh, (3 * H, H), jnp.float32, -s, s)
        b_ih = jax.random.uniform(k_bih, (3 * H,), jnp.float32, -s, s)
        b_hh = jax.random.uniform(k_bhh, (3 * H,), jnp.float32, -s, s)
        w2 = jax.random.uniform(k_w2, (C, H), jnp.float32, -s, s)
        b2 = jax.random.uniform(k_b2, (C,), jnp.float32, -s, s)

        # Inputs: token ids (T, B) and labels (B,)
        sentences = jax.random.randint(k_sent, (T, B), 0, V, jnp.int32)
        labels = jax.random.randint(k_lab, (B,), 0, C, jnp.int32)

        # Glue: embedding lookup + view(T, B, -1)  (data-dependent gather
        # stays in plain JAX; everything after it runs inside the kernel).
        embeds = jnp.take(emb_table, sentences, axis=0)          # (T, B, E)
        x_tbe = embeds.reshape(T, B, E)

        logits = gru_forward_pallas(x_tbe, w_ih, w_hh, b_ih, b_hh, w2, b2,
                                    chunk_timesteps=chunk_timesteps)
        logits = jax.block_until_ready(logits)

        # forward returns (hidden_op, labels)
        hidden_op, labels_out = logits, labels

        ref = gru_forward_ref(x_tbe, w_ih, w_hh, b_ih, b_hh, w2, b2)
        # bf16 MXU operands (f32 accumulation) -> relaxed tolerance vs f32.
        np.testing.assert_allclose(np.asarray(hidden_op), np.asarray(ref),
                                   rtol=5e-2, atol=5e-2)
        assert hidden_op.shape == (B, C)
        assert labels_out.shape == (B,)

    # Case 1: single gx chunk (T <= chunk size) — exercises the simple path.
    run_case(T=8, B=8, chunk_timesteps=16, case_idx=0)
    # Case 2: multi-chunk streamed-x path with a ragged tail (T % Tc != 0)
    # — exercises the DMA double buffer, gx prefetch and tail masking.
    run_case(T=10, B=16, chunk_timesteps=4, case_idx=1)

    print("KERNEL_OK")
</pallas_src>

<mosaic_0001>
module attributes {stable_mosaic.version = 11 : i64} {
  func.func @kernel(%arg0: i32, %arg1: memref<1x64x128xbf16, #tpu.memory_space<any>>, %arg2: memref<128x384xbf16, #tpu.memory_space<vmem>>, %arg3: memref<128x384xbf16, #tpu.memory_space<vmem>>, %arg4: memref<1x384xf32, #tpu.memory_space<vmem>>, %arg5: memref<1x128xf32, #tpu.memory_space<vmem>>, %arg6: memref<128x128xbf16, #tpu.memory_space<vmem>>, %arg7: memref<1x128xf32, #tpu.memory_space<vmem>>, %arg8: memref<8x128xf32, #tpu.memory_space<vmem>>, %arg9: memref<2x64x128xbf16, #tpu.memory_space<vmem>>, %arg10: memref<128x384xf32, #tpu.memory_space<vmem>>, %arg11: memref<2x!tpu.dma_semaphore, #tpu.memory_space<semaphore_mem>>) attributes {dimension_semantics = [#tpu.dimension_semantics<parallel>], iteration_bounds = array<i64: 1>, scalar_prefetch = 0 : i64, scratch_operands = 3 : i64, tpu.core_type = #tpu.core_type<tc>, window_params = [{}, {pipeline_mode = #tpu.pipeline_mode<synchronous>, transform_indices = @transform_1, window_bounds = array<i64: 128, 384>}, {pipeline_mode = #tpu.pipeline_mode<synchronous>, transform_indices = @transform_2, window_bounds = array<i64: 128, 384>}, {pipeline_mode = #tpu.pipeline_mode<synchronous>, transform_indices = @transform_3, window_bounds = array<i64: 1, 384>}, {pipeline_mode = #tpu.pipeline_mode<synchronous>, transform_indices = @transform_4, window_bounds = array<i64: 1, 128>}, {pipeline_mode = #tpu.pipeline_mode<synchronous>, transform_indices = @transform_5, window_bounds = array<i64: 128, 128>}, {pipeline_mode = #tpu.pipeline_mode<synchronous>, transform_indices = @transform_6, window_bounds = array<i64: 1, 128>}, {transform_indices = @transform_7, window_bounds = array<i64: 8, 128>}]} {
    %c1_i32 = arith.constant 1 : i32
    %0 = arith.muli %arg0, %c1_i32 : i32
    %c0_i32 = arith.constant 0 : i32
    %1 = arith.addi %0, %c0_i32 : i32
    %c0_i32_0 = arith.constant 0 : i32
    %c0_i32_1 = arith.constant 0 : i32
    %c0_i32_2 = arith.constant 0 : i32
    %c0_i32_3 = arith.constant 0 : i32
    %2 = tpu.memref_slice %arg1[%1, %c0_i32_2, %c0_i32_3] : memref<1x64x128xbf16, #tpu.memory_space<any>> -> memref<1x64x128xbf16, #tpu.memory_space<any>>
    %3 = tpu.memref_squeeze %2 : memref<1x64x128xbf16, #tpu.memory_space<any>> -> memref<64x128xbf16, #tpu.memory_space<any>>
    %c0_i32_4 = arith.constant 0 : i32
    %c0_i32_5 = arith.constant 0 : i32
    %4 = tpu.memref_slice %arg9[%c0_i32_0, %c0_i32_4, %c0_i32_5] : memref<2x64x128xbf16, #tpu.memory_space<vmem>> -> memref<1x64x128xbf16, #tpu.memory_space<vmem>>
    %5 = tpu.memref_squeeze %4 : memref<1x64x128xbf16, #tpu.memory_space<vmem>> -> memref<64x128xbf16, #tpu.memory_space<vmem>>
    %6 = tpu.memref_slice %arg11[%c0_i32_1] : memref<2x!tpu.dma_semaphore, #tpu.memory_space<semaphore_mem>> -> memref<1x!tpu.dma_semaphore, #tpu.memory_space<semaphore_mem>>
    %7 = tpu.memref_squeeze %6 : memref<1x!tpu.dma_semaphore, #tpu.memory_space<semaphore_mem>> -> memref<!tpu.dma_semaphore, #tpu.memory_space<semaphore_mem>>
    tpu.enqueue_dma source(%3 : memref<64x128xbf16, #tpu.memory_space<any>>) target(%5 : memref<64x128xbf16, #tpu.memory_space<vmem>>) target_semaphore(%7 : memref<!tpu.dma_semaphore, #tpu.memory_space<semaphore_mem>>)
    %c0_i32_6 = arith.constant 0 : i32
    %c0_i32_7 = arith.constant 0 : i32
    %c0_i32_8 = arith.constant 0 : i32
    %c0_i32_9 = arith.constant 0 : i32
    %c0_i32_10 = arith.constant 0 : i32
    %8 = tpu.memref_slice %arg1[%c0_i32_6, %c0_i32_9, %c0_i32_10] : memref<1x64x128xbf16, #tpu.memory_space<any>> -> memref<1x64x128xbf16, #tpu.memory_space<any>>
    %9 = tpu.memref_squeeze %8 : memref<1x64x128xbf16, #tpu.memory_space<any>> -> memref<64x128xbf16, #tpu.memory_space<any>>
    %c0_i32_11 = arith.constant 0 : i32
    %c0_i32_12 = arith.constant 0 : i32
    %10 = tpu.memref_slice %arg9[%c0_i32_7, %c0_i32_11, %c0_i32_12] : memref<2x64x128xbf16, #tpu.memory_space<vmem>> -> memref<1x64x128xbf16, #tpu.memory_space<vmem>>
    %11 = tpu.memref_squeeze %10 : memref<1x64x128xbf16, #tpu.memory_space<vmem>> -> memref<64x128xbf16, #tpu.memory_space<vmem>>
    %12 = tpu.memref_slice %arg11[%c0_i32_8] : memref<2x!tpu.dma_semaphore, #tpu.memory_space<semaphore_mem>> -> memref<1x!tpu.dma_semaphore, #tpu.memory_space<semaphore_mem>>
    %13 = tpu.memref_squeeze %12 : memref<1x!tpu.dma_semaphore, #tpu.memory_space<semaphore_mem>> -> memref<!tpu.dma_semaphore, #tpu.memory_space<semaphore_mem>>
    tpu.wait_dma2 semaphore(%13 : memref<!tpu.dma_semaphore, #tpu.memory_space<semaphore_mem>>) src(%9 : memref<64x128xbf16, #tpu.memory_space<any>>) dst(%11 : memref<64x128xbf16, #tpu.memory_space<vmem>>)
    %c0 = arith.constant 0 : index
    %c0_13 = arith.constant 0 : index
    %c0_14 = arith.constant 0 : index
    %14 = vector.load %arg9[%c0, %c0_13, %c0_14] : memref<2x64x128xbf16, #tpu.memory_space<vmem>>, vector<1x64x128xbf16>
    %15 = vector.shape_cast %14 : vector<1x64x128xbf16> to vector<64x128xbf16>
    %c0_15 = arith.constant 0 : index
    %c0_16 = arith.constant 0 : index
    %16 = vector.load %arg2[%c0_15, %c0_16] : memref<128x384xbf16, #tpu.memory_space<vmem>>, vector<128x384xbf16>
    %cst = arith.constant dense<0.000000e+00> : vector<64x384xf32>
    %17 = tpu.matmul %15, %16, %cst {dimension_numbers = #tpu.dot_dimension_numbers<[1], [0], [0], [1], [0, 0, 1, 1], [], []>} : vector<64x128xbf16>, vector<128x384xbf16>, vector<64x384xf32> -> vector<64x384xf32>
    %c0_17 = arith.constant 0 : index
    %c0_18 = arith.constant 0 : index
    %18 = vector.load %arg4[%c0_17, %c0_18] : memref<1x384xf32, #tpu.memory_space<vmem>>, vector<1x384xf32>
    %19 = vector.broadcast %18 : vector<1x384xf32> to vector<64x384xf32>
    %20 = arith.addf %17, %19 : vector<64x384xf32>
    %c0_19 = arith.constant 0 : index
    %c0_20 = arith.constant 0 : index
    %21 = vector.load %arg10[%c0_19, %c0_20] : memref<128x384xf32, #tpu.memory_space<vmem>>, vector<64x384xf32>
    tpu.vector_store %arg10[%c0_19, %c0_20], %20 {strides = array<i32>} : memref<128x384xf32, #tpu.memory_space<vmem>>, vector<64x384xf32>,
    %c0_21 = arith.constant 0 : index
    %c0_22 = arith.constant 0 : index
    %22 = vector.load %arg5[%c0_21, %c0_22] : memref<1x128xf32, #tpu.memory_space<vmem>>, vector<1x128xf32>
    %23 = vector.shape_cast %22 : vector<1x128xf32> to vector<1x128xf32>
    %24 = vector.broadcast %23 : vector<1x128xf32> to vector<8x128xf32>
    %cst_23 = arith.constant 0.000000e+00 : f32
    %25 = vector.broadcast %cst_23 : f32 to vector<8x128xf32>
    %26 = arith.truncf %25 : vector<8x128xf32> to vector<8x128xbf16>
    %c0_i32_24 = arith.constant 0 : i32
    %c2_i32 = arith.constant 2 : i32
    %27 = arith.remsi %c0_i32_24, %c2_i32 : i32
    %c1_i32_25 = arith.constant 1 : i32
    %28 = arith.subi %c1_i32_25, %27 : i32
    %c1_i32_26 = arith.constant 1 : i32
    %29 = arith.addi %c0_i32_24, %c1_i32_26 : i32
    %c1_i32_27 = arith.constant 1 : i32
    %30 = arith.cmpi slt, %29, %c1_i32_27 : i32
    %31 = arith.extui %30 : i1 to i32
    %c0_i32_28 = arith.constant 0 : i32
    %32 = arith.cmpi ne, %31, %c0_i32_28 : i32
    scf.if %32 {
      %c0_i32_104 = arith.constant 0 : i32
      %c0_i32_105 = arith.constant 0 : i32
      %c0_i32_106 = arith.constant 0 : i32
      %321 = tpu.memref_slice %arg1[%c0_i32_104, %c0_i32_105, %c0_i32_106] : memref<1x64x128xbf16, #tpu.memory_space<any>> -> memref<1x64x128xbf16, #tpu.memory_space<any>>
      %322 = tpu.memref_squeeze %321 : memref<1x64x128xbf16, #tpu.memory_space<any>> -> memref<64x128xbf16, #tpu.memory_space<any>>
      %c0_i32_107 = arith.constant 0 : i32
      %c0_i32_108 = arith.constant 0 : i32
      %323 = tpu.memref_slice %arg9[%28, %c0_i32_107, %c0_i32_108] : memref<2x64x128xbf16, #tpu.memory_space<vmem>> -> memref<1x64x128xbf16, #tpu.memory_space<vmem>>
      %324 = tpu.memref_squeeze %323 : memref<1x64x128xbf16, #tpu.memory_space<vmem>> -> memref<64x128xbf16, #tpu.memory_space<vmem>>
      %325 = tpu.memref_slice %arg11[%28] : memref<2x!tpu.dma_semaphore, #tpu.memory_space<semaphore_mem>> -> memref<1x!tpu.dma_semaphore, #tpu.memory_space<semaphore_mem>>
      %326 = tpu.memref_squeeze %325 : memref<1x!tpu.dma_semaphore, #tpu.memory_space<semaphore_mem>> -> memref<!tpu.dma_semaphore, #tpu.memory_space<semaphore_mem>>
      tpu.wait_dma2 semaphore(%326 : memref<!tpu.dma_semaphore, #tpu.memory_space<semaphore_mem>>) src(%322 : memref<64x128xbf16, #tpu.memory_space<any>>) dst(%324 : memref<64x128xbf16, #tpu.memory_space<vmem>>)
      %327 = arith.index_cast %28 : i32 to index
      %c0_109 = arith.constant 0 : index
      %c0_110 = arith.constant 0 : index
      %328 = vector.load %arg9[%327, %c0_109, %c0_110] : memref<2x64x128xbf16, #tpu.memory_space<vmem>>, vector<1x64x128xbf16>
      %329 = vector.shape_cast %328 : vector<1x64x128xbf16> to vector<64x128xbf16>
      %c0_111 = arith.constant 0 : index
      %c0_112 = arith.constant 0 : index
      %330 = vector.load %arg2[%c0_111, %c0_112] : memref<128x384xbf16, #tpu.memory_space<vmem>>, vector<128x384xbf16>
      %cst_113 = arith.constant dense<0.000000e+00> : vector<64x384xf32>
      %331 = tpu.matmul %329, %330, %cst_113 {dimension_numbers = #tpu.dot_dimension_numbers<[1], [0], [0], [1], [0, 0, 1, 1], [], []>} : vector<64x128xbf16>, vector<128x384xbf16>, vector<64x384xf32> -> vector<64x384xf32>
      %c0_114 = arith.constant 0 : index
      %c0_115 = arith.constant 0 : index
      %332 = vector.load %arg4[%c0_114, %c0_115] : memref<1x384xf32, #tpu.memory_space<vmem>>, vector<1x384xf32>
      %333 = vector.broadcast %332 : vector<1x384xf32> to vector<64x384xf32>
      %334 = arith.addf %331, %333 : vector<64x384xf32>
      %c64_i32_116 = arith.constant 64 : i32
      %335 = arith.muli %28, %c64_i32_116 : i32
      %336 = arith.index_cast %335 : i32 to index
      %c0_117 = arith.constant 0 : index
      %337 = vector.load %arg10[%336, %c0_117] : memref<128x384xf32, #tpu.memory_space<vmem>>, vector<64x384xf32>
      tpu.vector_store %arg10[%336, %c0_117], %334 {strides = array<i32>} : memref<128x384xf32, #tpu.memory_space<vmem>>, vector<64x384xf32>,
      %c2_i32_118 = arith.constant 2 : i32
      %338 = arith.addi %c0_i32_24, %c2_i32_118 : i32
      %c1_i32_119 = arith.constant 1 : i32
      %339 = arith.cmpi slt, %338, %c1_i32_119 : i32
      %340 = arith.extui %339 : i1 to i32
      %c0_i32_120 = arith.constant 0 : i32
      %341 = arith.cmpi ne, %340, %c0_i32_120 : i32
      scf.if %341 {
        %c2_i32_121 = arith.constant 2 : i32
        %342 = arith.addi %c0_i32_24, %c2_i32_121 : i32
        %343 = arith.addi %0, %342 : i32
        %c0_i32_122 = arith.constant 0 : i32
        %c0_i32_123 = arith.constant 0 : i32
        %344 = tpu.memref_slice %arg1[%343, %c0_i32_122, %c0_i32_123] : memref<1x64x128xbf16, #tpu.memory_space<any>> -> memref<1x64x128xbf16, #tpu.memory_space<any>>
        %345 = tpu.memref_squeeze %344 : memref<1x64x128xbf16, #tpu.memory_space<any>> -> memref<64x128xbf16, #tpu.memory_space<any>>
        %c0_i32_124 = arith.constant 0 : i32
        %c0_i32_125 = arith.constant 0 : i32
        %346 = tpu.memref_slice %arg9[%27, %c0_i32_124, %c0_i32_125] : memref<2x64x128xbf16, #tpu.memory_space<vmem>> -> memref<1x64x128xbf16, #tpu.memory_space<vmem>>
        %347 = tpu.memref_squeeze %346 : memref<1x64x128xbf16, #tpu.memory_space<vmem>> -> memref<64x128xbf16, #tpu.memory_space<vmem>>
        %348 = tpu.memref_slice %arg11[%27] : memref<2x!tpu.dma_semaphore, #tpu.memory_space<semaphore_mem>> -> memref<1x!tpu.dma_semaphore, #tpu.memory_space<semaphore_mem>>
        %349 = tpu.memref_squeeze %348 : memref<1x!tpu.dma_semaphore, #tpu.memory_space<semaphore_mem>> -> memref<!tpu.dma_semaphore, #tpu.memory_space<semaphore_mem>>
        tpu.enqueue_dma source(%345 : memref<64x128xbf16, #tpu.memory_space<any>>) target(%347 : memref<64x128xbf16, #tpu.memory_space<vmem>>) target_semaphore(%349 : memref<!tpu.dma_semaphore, #tpu.memory_space<semaphore_mem>>)
      } else {
      }
    } else {
    }
    %c64_i32 = arith.constant 64 : i32
    %33 = arith.muli %27, %c64_i32 : i32
    %c0_i32_29 = arith.constant 0 : i32
    %c0_30 = arith.constant 0 : index
    %c0_31 = arith.constant 0 : index
    %34 = vector.load %arg3[%c0_30, %c0_31] : memref<128x384xbf16, #tpu.memory_space<vmem>>, vector<128x384xbf16>
    %cst_32 = arith.constant dense<0.000000e+00> : vector<8x384xf32>
    %35 = tpu.matmul %26, %34, %cst_32 {dimension_numbers = #tpu.dot_dimension_numbers<[1], [0], [0], [1], [0, 0, 1, 1], [], []>} : vector<8x128xbf16>, vector<128x384xbf16>, vector<8x384xf32> -> vector<8x384xf32>
    %c8_i32 = arith.constant 8 : i32
    %36 = arith.muli %c0_i32_29, %c8_i32 : i32
    %37 = arith.addi %33, %36 : i32
    %38 = tpu.assume_multiple %37, 8 : i32
    %39 = arith.index_cast %38 : i32 to index
    %c0_33 = arith.constant 0 : index
    %40 = vector.load %arg10[%39, %c0_33] : memref<128x384xf32, #tpu.memory_space<vmem>>, vector<8x384xf32>
    %41 = vector.extract_strided_slice %40 {offsets = [0, 0], sizes = [8, 128], strides = [1, 1]} : vector<8x384xf32> to vector<8x128xf32>
    %42 = vector.extract_strided_slice %35 {offsets = [0, 0], sizes = [8, 128], strides = [1, 1]} : vector<8x384xf32> to vector<8x128xf32>
    %43 = arith.addf %41, %42 : vector<8x128xf32>
    %44 = arith.negf %43 : vector<8x128xf32>
    %45 = math.exp %44 : vector<8x128xf32>
    %cst_34 = arith.constant 1.000000e+00 : f32
    %46 = vector.broadcast %cst_34 : f32 to vector<8x128xf32>
    %47 = arith.addf %46, %45 : vector<8x128xf32>
    %48 = arith.divf %46, %47 : vector<8x128xf32>
    %49 = vector.extract_strided_slice %40 {offsets = [0, 128], sizes = [8, 128], strides = [1, 1]} : vector<8x384xf32> to vector<8x128xf32>
    %50 = vector.extract_strided_slice %35 {offsets = [0, 128], sizes = [8, 128], strides = [1, 1]} : vector<8x384xf32> to vector<8x128xf32>
    %51 = arith.addf %49, %50 : vector<8x128xf32>
    %52 = arith.negf %51 : vector<8x128xf32>
    %53 = math.exp %52 : vector<8x128xf32>
    %cst_35 = arith.constant 1.000000e+00 : f32
    %54 = vector.broadcast %cst_35 : f32 to vector<8x128xf32>
    %55 = arith.addf %54, %53 : vector<8x128xf32>
    %56 = arith.divf %54, %55 : vector<8x128xf32>
    %57 = vector.extract_strided_slice %40 {offsets = [0, 256], sizes = [8, 128], strides = [1, 1]} : vector<8x384xf32> to vector<8x128xf32>
    %58 = vector.extract_strided_slice %35 {offsets = [0, 256], sizes = [8, 128], strides = [1, 1]} : vector<8x384xf32> to vector<8x128xf32>
    %59 = arith.addf %58, %24 : vector<8x128xf32>
    %60 = arith.mulf %48, %59 : vector<8x128xf32>
    %61 = arith.addf %57, %60 : vector<8x128xf32>
    %62 = math.tanh %61 : vector<8x128xf32>
    %cst_36 = arith.constant 1.000000e+00 : f32
    %63 = vector.broadcast %cst_36 : f32 to vector<8x128xf32>
    %64 = arith.subf %63, %56 : vector<8x128xf32>
    %65 = arith.mulf %64, %62 : vector<8x128xf32>
    %66 = arith.mulf %56, %25 : vector<8x128xf32>
    %67 = arith.addf %65, %66 : vector<8x128xf32>
    %68 = arith.truncf %67 : vector<8x128xf32> to vector<8x128xbf16>
    %c1_i32_37 = arith.constant 1 : i32
    %c0_38 = arith.constant 0 : index
    %c0_39 = arith.constant 0 : index
    %69 = vector.load %arg3[%c0_38, %c0_39] : memref<128x384xbf16, #tpu.memory_space<vmem>>, vector<128x384xbf16>
    %cst_40 = arith.constant dense<0.000000e+00> : vector<8x384xf32>
    %70 = tpu.matmul %68, %69, %cst_40 {dimension_numbers = #tpu.dot_dimension_numbers<[1], [0], [0], [1], [0, 0, 1, 1], [], []>} : vector<8x128xbf16>, vector<128x384xbf16>, vector<8x384xf32> -> vector<8x384xf32>
    %c8_i32_41 = arith.constant 8 : i32
    %71 = arith.muli %c1_i32_37, %c8_i32_41 : i32
    %72 = arith.addi %33, %71 : i32
    %73 = tpu.assume_multiple %72, 8 : i32
    %74 = arith.index_cast %73 : i32 to index
    %c0_42 = arith.constant 0 : index
    %75 = vector.load %arg10[%74, %c0_42] : memref<128x384xf32, #tpu.memory_space<vmem>>, vector<8x384xf32>
    %76 = vector.extract_strided_slice %75 {offsets = [0, 0], sizes = [8, 128], strides = [1, 1]} : vector<8x384xf32> to vector<8x128xf32>
    %77 = vector.extract_strided_slice %70 {offsets = [0, 0], sizes = [8, 128], strides = [1, 1]} : vector<8x384xf32> to vector<8x128xf32>
    %78 = arith.addf %76, %77 : vector<8x128xf32>
    %79 = arith.negf %78 : vector<8x128xf32>
    %80 = math.exp %79 : vector<8x128xf32>
    %cst_43 = arith.constant 1.000000e+00 : f32
    %81 = vector.broadcast %cst_43 : f32 to vector<8x128xf32>
    %82 = arith.addf %81, %80 : vector<8x128xf32>
    %83 = arith.divf %81, %82 : vector<8x128xf32>
    %84 = vector.extract_strided_slice %75 {offsets = [0, 128], sizes = [8, 128], strides = [1, 1]} : vector<8x384xf32> to vector<8x128xf32>
    %85 = vector.extract_strided_slice %70 {offsets = [0, 128], sizes = [8, 128], strides = [1, 1]} : vector<8x384xf32> to vector<8x128xf32>
    %86 = arith.addf %84, %85 : vector<8x128xf32>
    %87 = arith.negf %86 : vector<8x128xf32>
    %88 = math.exp %87 : vector<8x128xf32>
    %cst_44 = arith.constant 1.000000e+00 : f32
    %89 = vector.broadcast %cst_44 : f32 to vector<8x128xf32>
    %90 = arith.addf %89, %88 : vector<8x128xf32>
    %91 = arith.divf %89, %90 : vector<8x128xf32>
    %92 = vector.extract_strided_slice %75 {offsets = [0, 256], sizes = [8, 128], strides = [1, 1]} : vector<8x384xf32> to vector<8x128xf32>
    %93 = vector.extract_strided_slice %70 {offsets = [0, 256], sizes = [8, 128], strides = [1, 1]} : vector<8x384xf32> to vector<8x128xf32>
    %94 = arith.addf %93, %24 : vector<8x128xf32>
    %95 = arith.mulf %83, %94 : vector<8x128xf32>
    %96 = arith.addf %92, %95 : vector<8x128xf32>
    %97 = math.tanh %96 : vector<8x128xf32>
    %cst_45 = arith.constant 1.000000e+00 : f32
    %98 = vector.broadcast %cst_45 : f32 to vector<8x128xf32>
    %99 = arith.subf %98, %91 : vector<8x128xf32>
    %100 = arith.mulf %99, %97 : vector<8x128xf32>
    %101 = arith.mulf %91, %67 : vector<8x128xf32>
    %102 = arith.addf %100, %101 : vector<8x128xf32>
    %103 = arith.truncf %102 : vector<8x128xf32> to vector<8x128xbf16>
    %c2_i32_46 = arith.constant 2 : i32
    %c0_47 = arith.constant 0 : index
    %c0_48 = arith.constant 0 : index
    %104 = vector.load %arg3[%c0_47, %c0_48] : memref<128x384xbf16, #tpu.memory_space<vmem>>, vector<128x384xbf16>
    %cst_49 = arith.constant dense<0.000000e+00> : vector<8x384xf32>
    %105 = tpu.matmul %103, %104, %cst_49 {dimension_numbers = #tpu.dot_dimension_numbers<[1], [0], [0], [1], [0, 0, 1, 1], [], []>} : vector<8x128xbf16>, vector<128x384xbf16>, vector<8x384xf32> -> vector<8x384xf32>
    %c8_i32_50 = arith.constant 8 : i32
    %106 = arith.muli %c2_i32_46, %c8_i32_50 : i32
    %107 = arith.addi %33, %106 : i32
    %108 = tpu.assume_multiple %107, 8 : i32
    %109 = arith.index_cast %108 : i32 to index
    %c0_51 = arith.constant 0 : index
    %110 = vector.load %arg10[%109, %c0_51] : memref<128x384xf32, #tpu.memory_space<vmem>>, vector<8x384xf32>
    %111 = vector.extract_strided_slice %110 {offsets = [0, 0], sizes = [8, 128], strides = [1, 1]} : vector<8x384xf32> to vector<8x128xf32>
    %112 = vector.extract_strided_slice %105 {offsets = [0, 0], sizes = [8, 128], strides = [1, 1]} : vector<8x384xf32> to vector<8x128xf32>
    %113 = arith.addf %111, %112 : vector<8x128xf32>
    %114 = arith.negf %113 : vector<8x128xf32>
    %115 = math.exp %114 : vector<8x128xf32>
    %cst_52 = arith.constant 1.000000e+00 : f32
    %116 = vector.broadcast %cst_52 : f32 to vector<8x128xf32>
    %117 = arith.addf %116, %115 : vector<8x128xf32>
    %118 = arith.divf %116, %117 : vector<8x128xf32>
    %119 = vector.extract_strided_slice %110 {offsets = [0, 128], sizes = [8, 128], strides = [1, 1]} : vector<8x384xf32> to vector<8x128xf32>
    %120 = vector.extract_strided_slice %105 {offsets = [0, 128], sizes = [8, 128], strides = [1, 1]} : vector<8x384xf32> to vector<8x128xf32>
    %121 = arith.addf %119, %120 : vector<8x128xf32>
    %122 = arith.negf %121 : vector<8x128xf32>
    %123 = math.exp %122 : vector<8x128xf32>
    %cst_53 = arith.constant 1.000000e+00 : f32
    %124 = vector.broadcast %cst_53 : f32 to vector<8x128xf32>
    %125 = arith.addf %124, %123 : vector<8x128xf32>
    %126 = arith.divf %124, %125 : vector<8x128xf32>
    %127 = vector.extract_strided_slice %110 {offsets = [0, 256], sizes = [8, 128], strides = [1, 1]} : vector<8x384xf32> to vector<8x128xf32>
    %128 = vector.extract_strided_slice %105 {offsets = [0, 256], sizes = [8, 128], strides = [1, 1]} : vector<8x384xf32> to vector<8x128xf32>
    %129 = arith.addf %128, %24 : vector<8x128xf32>
    %130 = arith.mulf %118, %129 : vector<8x128xf32>
    %131 = arith.addf %127, %130 : vector<8x128xf32>
    %132 = math.tanh %131 : vector<8x128xf32>
    %cst_54 = arith.constant 1.000000e+00 : f32
    %133 = vector.broadcast %cst_54 : f32 to vector<8x128xf32>
    %134 = arith.subf %133, %126 : vector<8x128xf32>
    %135 = arith.mulf %134, %132 : vector<8x128xf32>
    %136 = arith.mulf %126, %102 : vector<8x128xf32>
    %137 = arith.addf %135, %136 : vector<8x128xf32>
    %138 = arith.truncf %137 : vector<8x128xf32> to vector<8x128xbf16>
    %c3_i32 = arith.constant 3 : i32
    %c0_55 = arith.constant 0 : index
    %c0_56 = arith.constant 0 : index
    %139 = vector.load %arg3[%c0_55, %c0_56] : memref<128x384xbf16, #tpu.memory_space<vmem>>, vector<128x384xbf16>
    %cst_57 = arith.constant dense<0.000000e+00> : vector<8x384xf32>
    %140 = tpu.matmul %138, %139, %cst_57 {dimension_numbers = #tpu.dot_dimension_numbers<[1], [0], [0], [1], [0, 0, 1, 1], [], []>} : vector<8x128xbf16>, vector<128x384xbf16>, vector<8x384xf32> -> vector<8x384xf32>
    %c8_i32_58 = arith.constant 8 : i32
    %141 = arith.muli %c3_i32, %c8_i32_58 : i32
    %142 = arith.addi %33, %141 : i32
    %143 = tpu.assume_multiple %142, 8 : i32
    %144 = arith.index_cast %143 : i32 to index
    %c0_59 = arith.constant 0 : index
    %145 = vector.load %arg10[%144, %c0_59] : memref<128x384xf32, #tpu.memory_space<vmem>>, vector<8x384xf32>
    %146 = vector.extract_strided_slice %145 {offsets = [0, 0], sizes = [8, 128], strides = [1, 1]} : vector<8x384xf32> to vector<8x128xf32>
    %147 = vector.extract_strided_slice %140 {offsets = [0, 0], sizes = [8, 128], strides = [1, 1]} : vector<8x384xf32> to vector<8x128xf32>
    %148 = arith.addf %146, %147 : vector<8x128xf32>
    %149 = arith.negf %148 : vector<8x128xf32>
    %150 = math.exp %149 : vector<8x128xf32>
    %cst_60 = arith.constant 1.000000e+00 : f32
    %151 = vector.broadcast %cst_60 : f32 to vector<8x128xf32>
    %152 = arith.addf %151, %150 : vector<8x128xf32>
    %153 = arith.divf %151, %152 : vector<8x128xf32>
    %154 = vector.extract_strided_slice %145 {offsets = [0, 128], sizes = [8, 128], strides = [1, 1]} : vector<8x384xf32> to vector<8x128xf32>
    %155 = vector.extract_strided_slice %140 {offsets = [0, 128], sizes = [8, 128], strides = [1, 1]} : vector<8x384xf32> to vector<8x128xf32>
    %156 = arith.addf %154, %155 : vector<8x128xf32>
    %157 = arith.negf %156 : vector<8x128xf32>
    %158 = math.exp %157 : vector<8x128xf32>
    %cst_61 = arith.constant 1.000000e+00 : f32
    %159 = vector.broadcast %cst_61 : f32 to vector<8x128xf32>
    %160 = arith.addf %159, %158 : vector<8x128xf32>
    %161 = arith.divf %159, %160 : vector<8x128xf32>
    %162 = vector.extract_strided_slice %145 {offsets = [0, 256], sizes = [8, 128], strides = [1, 1]} : vector<8x384xf32> to vector<8x128xf32>
    %163 = vector.extract_strided_slice %140 {offsets = [0, 256], sizes = [8, 128], strides = [1, 1]} : vector<8x384xf32> to vector<8x128xf32>
    %164 = arith.addf %163, %24 : vector<8x128xf32>
    %165 = arith.mulf %153, %164 : vector<8x128xf32>
    %166 = arith.addf %162, %165 : vector<8x128xf32>
    %167 = math.tanh %166 : vector<8x128xf32>
    %cst_62 = arith.constant 1.000000e+00 : f32
    %168 = vector.broadcast %cst_62 : f32 to vector<8x128xf32>
    %169 = arith.subf %168, %161 : vector<8x128xf32>
    %170 = arith.mulf %169, %167 : vector<8x128xf32>
    %171 = arith.mulf %161, %137 : vector<8x128xf32>
    %172 = arith.addf %170, %171 : vector<8x128xf32>
    %173 = arith.truncf %172 : vector<8x128xf32> to vector<8x128xbf16>
    %c4_i32 = arith.constant 4 : i32
    %c0_63 = arith.constant 0 : index
    %c0_64 = arith.constant 0 : index
    %174 = vector.load %arg3[%c0_63, %c0_64] : memref<128x384xbf16, #tpu.memory_space<vmem>>, vector<128x384xbf16>
    %cst_65 = arith.constant dense<0.000000e+00> : vector<8x384xf32>
    %175 = tpu.matmul %173, %174, %cst_65 {dimension_numbers = #tpu.dot_dimension_numbers<[1], [0], [0], [1], [0, 0, 1, 1], [], []>} : vector<8x128xbf16>, vector<128x384xbf16>, vector<8x384xf32> -> vector<8x384xf32>
    %c8_i32_66 = arith.constant 8 : i32
    %176 = arith.muli %c4_i32, %c8_i32_66 : i32
    %177 = arith.addi %33, %176 : i32
    %178 = tpu.assume_multiple %177, 8 : i32
    %179 = arith.index_cast %178 : i32 to index
    %c0_67 = arith.constant 0 : index
    %180 = vector.load %arg10[%179, %c0_67] : memref<128x384xf32, #tpu.memory_space<vmem>>, vector<8x384xf32>
    %181 = vector.extract_strided_slice %180 {offsets = [0, 0], sizes = [8, 128], strides = [1, 1]} : vector<8x384xf32> to vector<8x128xf32>
    %182 = vector.extract_strided_slice %175 {offsets = [0, 0], sizes = [8, 128], strides = [1, 1]} : vector<8x384xf32> to vector<8x128xf32>
    %183 = arith.addf %181, %182 : vector<8x128xf32>
    %184 = arith.negf %183 : vector<8x128xf32>
    %185 = math.exp %184 : vector<8x128xf32>
    %cst_68 = arith.constant 1.000000e+00 : f32
    %186 = vector.broadcast %cst_68 : f32 to vector<8x128xf32>
    %187 = arith.addf %186, %185 : vector<8x128xf32>
    %188 = arith.divf %186, %187 : vector<8x128xf32>
    %189 = vector.extract_strided_slice %180 {offsets = [0, 128], sizes = [8, 128], strides = [1, 1]} : vector<8x384xf32> to vector<8x128xf32>
    %190 = vector.extract_strided_slice %175 {offsets = [0, 128], sizes = [8, 128], strides = [1, 1]} : vector<8x384xf32> to vector<8x128xf32>
    %191 = arith.addf %189, %190 : vector<8x128xf32>
    %192 = arith.negf %191 : vector<8x128xf32>
    %193 = math.exp %192 : vector<8x128xf32>
    %cst_69 = arith.constant 1.000000e+00 : f32
    %194 = vector.broadcast %cst_69 : f32 to vector<8x128xf32>
    %195 = arith.addf %194, %193 : vector<8x128xf32>
    %196 = arith.divf %194, %195 : vector<8x128xf32>
    %197 = vector.extract_strided_slice %180 {offsets = [0, 256], sizes = [8, 128], strides = [1, 1]} : vector<8x384xf32> to vector<8x128xf32>
    %198 = vector.extract_strided_slice %175 {offsets = [0, 256], sizes = [8, 128], strides = [1, 1]} : vector<8x384xf32> to vector<8x128xf32>
    %199 = arith.addf %198, %24 : vector<8x128xf32>
    %200 = arith.mulf %188, %199 : vector<8x128xf32>
    %201 = arith.addf %197, %200 : vector<8x128xf32>
    %202 = math.tanh %201 : vector<8x128xf32>
    %cst_70 = arith.constant 1.000000e+00 : f32
    %203 = vector.broadcast %cst_70 : f32 to vector<8x128xf32>
    %204 = arith.subf %203, %196 : vector<8x128xf32>
    %205 = arith.mulf %204, %202 : vector<8x128xf32>
    %206 = arith.mulf %196, %172 : vector<8x128xf32>
    %207 = arith.addf %205, %206 : vector<8x128xf32>
    %208 = arith.truncf %207 : vector<8x128xf32> to vector<8x128xbf16>
    %c5_i32 = arith.constant 5 : i32
    %c0_71 = arith.constant 0 : index
    %c0_72 = arith.constant 0 : index
    %209 = vector.load %arg3[%c0_71, %c0_72] : memref<128x384xbf16, #tpu.memory_space<vmem>>, vector<128x384xbf16>
    %cst_73 = arith.constant dense<0.000000e+00> : vector<8x384xf32>
    %210 = tpu.matmul %208, %209, %cst_73 {dimension_numbers = #tpu.dot_dimension_numbers<[1], [0], [0], [1], [0, 0, 1, 1], [], []>} : vector<8x128xbf16>, vector<128x384xbf16>, vector<8x384xf32> -> vector<8x384xf32>
    %c8_i32_74 = arith.constant 8 : i32
    %211 = arith.muli %c5_i32, %c8_i32_74 : i32
    %212 = arith.addi %33, %211 : i32
    %213 = tpu.assume_multiple %212, 8 : i32
    %214 = arith.index_cast %213 : i32 to index
    %c0_75 = arith.constant 0 : index
    %215 = vector.load %arg10[%214, %c0_75] : memref<128x384xf32, #tpu.memory_space<vmem>>, vector<8x384xf32>
    %216 = vector.extract_strided_slice %215 {offsets = [0, 0], sizes = [8, 128], strides = [1, 1]} : vector<8x384xf32> to vector<8x128xf32>
    %217 = vector.extract_strided_slice %210 {offsets = [0, 0], sizes = [8, 128], strides = [1, 1]} : vector<8x384xf32> to vector<8x128xf32>
    %218 = arith.addf %216, %217 : vector<8x128xf32>
    %219 = arith.negf %218 : vector<8x128xf32>
    %220 = math.exp %219 : vector<8x128xf32>
    %cst_76 = arith.constant 1.000000e+00 : f32
    %221 = vector.broadcast %cst_76 : f32 to vector<8x128xf32>
    %222 = arith.addf %221, %220 : vector<8x128xf32>
    %223 = arith.divf %221, %222 : vector<8x128xf32>
    %224 = vector.extract_strided_slice %215 {offsets = [0, 128], sizes = [8, 128], strides = [1, 1]} : vector<8x384xf32> to vector<8x128xf32>
    %225 = vector.extract_strided_slice %210 {offsets = [0, 128], sizes = [8, 128], strides = [1, 1]} : vector<8x384xf32> to vector<8x128xf32>
    %226 = arith.addf %224, %225 : vector<8x128xf32>
    %227 = arith.negf %226 : vector<8x128xf32>
    %228 = math.exp %227 : vector<8x128xf32>
    %cst_77 = arith.constant 1.000000e+00 : f32
    %229 = vector.broadcast %cst_77 : f32 to vector<8x128xf32>
    %230 = arith.addf %229, %228 : vector<8x128xf32>
    %231 = arith.divf %229, %230 : vector<8x128xf32>
    %232 = vector.extract_strided_slice %215 {offsets = [0, 256], sizes = [8, 128], strides = [1, 1]} : vector<8x384xf32> to vector<8x128xf32>
    %233 = vector.extract_strided_slice %210 {offsets = [0, 256], sizes = [8, 128], strides = [1, 1]} : vector<8x384xf32> to vector<8x128xf32>
    %234 = arith.addf %233, %24 : vector<8x128xf32>
    %235 = arith.mulf %223, %234 : vector<8x128xf32>
    %236 = arith.addf %232, %235 : vector<8x128xf32>
    %237 = math.tanh %236 : vector<8x128xf32>
    %cst_78 = arith.constant 1.000000e+00 : f32
    %238 = vector.broadcast %cst_78 : f32 to vector<8x128xf32>
    %239 = arith.subf %238, %231 : vector<8x128xf32>
    %240 = arith.mulf %239, %237 : vector<8x128xf32>
    %241 = arith.mulf %231, %207 : vector<8x128xf32>
    %242 = arith.addf %240, %241 : vector<8x128xf32>
    %243 = arith.truncf %242 : vector<8x128xf32> to vector<8x128xbf16>
    %c6_i32 = arith.constant 6 : i32
    %c0_79 = arith.constant 0 : index
    %c0_80 = arith.constant 0 : index
    %244 = vector.load %arg3[%c0_79, %c0_80] : memref<128x384xbf16, #tpu.memory_space<vmem>>, vector<128x384xbf16>
    %cst_81 = arith.constant dense<0.000000e+00> : vector<8x384xf32>
    %245 = tpu.matmul %243, %244, %cst_81 {dimension_numbers = #tpu.dot_dimension_numbers<[1], [0], [0], [1], [0, 0, 1, 1], [], []>} : vector<8x128xbf16>, vector<128x384xbf16>, vector<8x384xf32> -> vector<8x384xf32>
    %c8_i32_82 = arith.constant 8 : i32
    %246 = arith.muli %c6_i32, %c8_i32_82 : i32
    %247 = arith.addi %33, %246 : i32
    %248 = tpu.assume_multiple %247, 8 : i32
    %249 = arith.index_cast %248 : i32 to index
    %c0_83 = arith.constant 0 : index
    %250 = vector.load %arg10[%249, %c0_83] : memref<128x384xf32, #tpu.memory_space<vmem>>, vector<8x384xf32>
    %251 = vector.extract_strided_slice %250 {offsets = [0, 0], sizes = [8, 128], strides = [1, 1]} : vector<8x384xf32> to vector<8x128xf32>
    %252 = vector.extract_strided_slice %245 {offsets = [0, 0], sizes = [8, 128], strides = [1, 1]} : vector<8x384xf32> to vector<8x128xf32>
    %253 = arith.addf %251, %252 : vector<8x128xf32>
    %254 = arith.negf %253 : vector<8x128xf32>
    %255 = math.exp %254 : vector<8x128xf32>
    %cst_84 = arith.constant 1.000000e+00 : f32
    %256 = vector.broadcast %cst_84 : f32 to vector<8x128xf32>
    %257 = arith.addf %256, %255 : vector<8x128xf32>
    %258 = arith.divf %256, %257 : vector<8x128xf32>
    %259 = vector.extract_strided_slice %250 {offsets = [0, 128], sizes = [8, 128], strides = [1, 1]} : vector<8x384xf32> to vector<8x128xf32>
    %260 = vector.extract_strided_slice %245 {offsets = [0, 128], sizes = [8, 128], strides = [1, 1]} : vector<8x384xf32> to vector<8x128xf32>
    %261 = arith.addf %259, %260 : vector<8x128xf32>
    %262 = arith.negf %261 : vector<8x128xf32>
    %263 = math.exp %262 : vector<8x128xf32>
    %cst_85 = arith.constant 1.000000e+00 : f32
    %264 = vector.broadcast %cst_85 : f32 to vector<8x128xf32>
    %265 = arith.addf %264, %263 : vector<8x128xf32>
    %266 = arith.divf %264, %265 : vector<8x128xf32>
    %267 = vector.extract_strided_slice %250 {offsets = [0, 256], sizes = [8, 128], strides = [1, 1]} : vector<8x384xf32> to vector<8x128xf32>
    %268 = vector.extract_strided_slice %245 {offsets = [0, 256], sizes = [8, 128], strides = [1, 1]} : vector<8x384xf32> to vector<8x128xf32>
    %269 = arith.addf %268, %24 : vector<8x128xf32>
    %270 = arith.mulf %258, %269 : vector<8x128xf32>
    %271 = arith.addf %267, %270 : vector<8x128xf32>
    %272 = math.tanh %271 : vector<8x128xf32>
    %cst_86 = arith.constant 1.000000e+00 : f32
    %273 = vector.broadcast %cst_86 : f32 to vector<8x128xf32>
    %274 = arith.subf %273, %266 : vector<8x128xf32>
    %275 = arith.mulf %274, %272 : vector<8x128xf32>
    %276 = arith.mulf %266, %242 : vector<8x128xf32>
    %277 = arith.addf %275, %276 : vector<8x128xf32>
    %278 = arith.truncf %277 : vector<8x128xf32> to vector<8x128xbf16>
    %c7_i32 = arith.constant 7 : i32
    %c0_87 = arith.constant 0 : index
    %c0_88 = arith.constant 0 : index
    %279 = vector.load %arg3[%c0_87, %c0_88] : memref<128x384xbf16, #tpu.memory_space<vmem>>, vector<128x384xbf16>
    %cst_89 = arith.constant dense<0.000000e+00> : vector<8x384xf32>
    %280 = tpu.matmul %278, %279, %cst_89 {dimension_numbers = #tpu.dot_dimension_numbers<[1], [0], [0], [1], [0, 0, 1, 1], [], []>} : vector<8x128xbf16>, vector<128x384xbf16>, vector<8x384xf32> -> vector<8x384xf32>
    %c8_i32_90 = arith.constant 8 : i32
    %281 = arith.muli %c7_i32, %c8_i32_90 : i32
    %282 = arith.addi %33, %281 : i32
    %283 = tpu.assume_multiple %282, 8 : i32
    %284 = arith.index_cast %283 : i32 to index
    %c0_91 = arith.constant 0 : index
    %285 = vector.load %arg10[%284, %c0_91] : memref<128x384xf32, #tpu.memory_space<vmem>>, vector<8x384xf32>
    %286 = vector.extract_strided_slice %285 {offsets = [0, 0], sizes = [8, 128], strides = [1, 1]} : vector<8x384xf32> to vector<8x128xf32>
    %287 = vector.extract_strided_slice %280 {offsets = [0, 0], sizes = [8, 128], strides = [1, 1]} : vector<8x384xf32> to vector<8x128xf32>
    %288 = arith.addf %286, %287 : vector<8x128xf32>
    %289 = arith.negf %288 : vector<8x128xf32>
    %290 = math.exp %289 : vector<8x128xf32>
    %cst_92 = arith.constant 1.000000e+00 : f32
    %291 = vector.broadcast %cst_92 : f32 to vector<8x128xf32>
    %292 = arith.addf %291, %290 : vector<8x128xf32>
    %293 = arith.divf %291, %292 : vector<8x128xf32>
    %294 = vector.extract_strided_slice %285 {offsets = [0, 128], sizes = [8, 128], strides = [1, 1]} : vector<8x384xf32> to vector<8x128xf32>
    %295 = vector.extract_strided_slice %280 {offsets = [0, 128], sizes = [8, 128], strides = [1, 1]} : vector<8x384xf32> to vector<8x128xf32>
    %296 = arith.addf %294, %295 : vector<8x128xf32>
    %297 = arith.negf %296 : vector<8x128xf32>
    %298 = math.exp %297 : vector<8x128xf32>
    %cst_93 = arith.constant 1.000000e+00 : f32
    %299 = vector.broadcast %cst_93 : f32 to vector<8x128xf32>
    %300 = arith.addf %299, %298 : vector<8x128xf32>
    %301 = arith.divf %299, %300 : vector<8x128xf32>
    %302 = vector.extract_strided_slice %285 {offsets = [0, 256], sizes = [8, 128], strides = [1, 1]} : vector<8x384xf32> to vector<8x128xf32>
    %303 = vector.extract_strided_slice %280 {offsets = [0, 256], sizes = [8, 128], strides = [1, 1]} : vector<8x384xf32> to vector<8x128xf32>
    %304 = arith.addf %303, %24 : vector<8x128xf32>
    %305 = arith.mulf %293, %304 : vector<8x128xf32>
    %306 = arith.addf %302, %305 : vector<8x128xf32>
    %307 = math.tanh %306 : vector<8x128xf32>
    %cst_94 = arith.constant 1.000000e+00 : f32
    %308 = vector.broadcast %cst_94 : f32 to vector<8x128xf32>
    %309 = arith.subf %308, %301 : vector<8x128xf32>
    %310 = arith.mulf %309, %307 : vector<8x128xf32>
    %311 = arith.mulf %301, %277 : vector<8x128xf32>
    %312 = arith.addf %310, %311 : vector<8x128xf32>
    %313 = arith.truncf %312 : vector<8x128xf32> to vector<8x128xbf16>
    %c8_i32_95 = arith.constant 8 : i32
    %c1_i32_96 = arith.constant 1 : i32
    %314 = arith.truncf %312 : vector<8x128xf32> to vector<8x128xbf16>
    %c0_97 = arith.constant 0 : index
    %c0_98 = arith.constant 0 : index
    %315 = vector.load %arg6[%c0_97, %c0_98] : memref<128x128xbf16, #tpu.memory_space<vmem>>, vector<128x128xbf16>
    %cst_99 = arith.constant dense<0.000000e+00> : vector<8x128xf32>
    %316 = tpu.matmul %314, %315, %cst_99 {dimension_numbers = #tpu.dot_dimension_numbers<[1], [0], [0], [1], [0, 0, 1, 1], [], []>} : vector<8x128xbf16>, vector<128x128xbf16>, vector<8x128xf32> -> vector<8x128xf32>
    %c0_100 = arith.constant 0 : index
    %c0_101 = arith.constant 0 : index
    %317 = vector.load %arg7[%c0_100, %c0_101] : memref<1x128xf32, #tpu.memory_space<vmem>>, vector<1x128xf32>
    %318 = vector.broadcast %317 : vector<1x128xf32> to vector<8x128xf32>
    %319 = arith.addf %316, %318 : vector<8x128xf32>
    %c0_102 = arith.constant 0 : index
    %c0_103 = arith.constant 0 : index
    %320 = vector.load %arg8[%c0_102, %c0_103] : memref<8x128xf32, #tpu.memory_space<vmem>>, vector<8x128xf32>
    tpu.vector_store %arg8[%c0_102, %c0_103], %319 {strides = array<i32>} : memref<8x128xf32, #tpu.memory_space<vmem>>, vector<8x128xf32>,
    return
  }
  func.func @transform_1(%arg0: i32) -> (i32, i32) {
    %c0_i32 = arith.constant 0 : i32
    %c0_i32_0 = arith.constant 0 : i32
    %c0_i32_1 = arith.constant 0 : i32
    return %c0_i32, %c0_i32_0 : i32, i32
  }
  func.func @transform_2(%arg0: i32) -> (i32, i32) {
    %c0_i32 = arith.constant 0 : i32
    %c0_i32_0 = arith.constant 0 : i32
    %c0_i32_1 = arith.constant 0 : i32
    return %c0_i32, %c0_i32_0 : i32, i32
  }
  func.func @transform_3(%arg0: i32) -> (i32, i32) {
    %c0_i32 = arith.constant 0 : i32
    %c0_i32_0 = arith.constant 0 : i32
    %c0_i32_1 = arith.constant 0 : i32
    return %c0_i32, %c0_i32_0 : i32, i32
  }
  func.func @transform_4(%arg0: i32) -> (i32, i32) {
    %c0_i32 = arith.constant 0 : i32
    %c0_i32_0 = arith.constant 0 : i32
    %c0_i32_1 = arith.constant 0 : i32
    return %c0_i32, %c0_i32_0 : i32, i32
  }
  func.func @transform_5(%arg0: i32) -> (i32, i32) {
    %c0_i32 = arith.constant 0 : i32
    %c0_i32_0 = arith.constant 0 : i32
    %c0_i32_1 = arith.constant 0 : i32
    return %c0_i32, %c0_i32_0 : i32, i32
  }
  func.func @transform_6(%arg0: i32) -> (i32, i32) {
    %c0_i32 = arith.constant 0 : i32
    %c0_i32_0 = arith.constant 0 : i32
    %c0_i32_1 = arith.constant 0 : i32
    return %c0_i32, %c0_i32_0 : i32, i32
  }
  func.func @transform_7(%arg0: i32) -> (i32, i32) {
    %c0_i32 = arith.constant 0 : i32
    %c0_i32_0 = arith.constant 0 : i32
    return %arg0, %c0_i32 : i32, i32
  }
}

</mosaic_0001>

<bundles_post_ra>
// kernel: tpu_custom_call.1
= control target key start
LH: loop header
LB: loop body
LE: loop exit
PB: predicated region body
PF: predicated region fallthrough
CT: control target
= control target key end

     0   :  { %12 = vsyncpa [#allocation6], 0  ;;  %s2463_s0 = inlined_call_operand.hbm [shape: bf16[1,64,128], index: 0, kind: input, shape index: {}]   ;;  %s2464_s1 = inlined_call_operand.hbm [shape: bf16[128,384], index: 1, kind: input, shape index: {}]   ;;  %s2465_s2 = inlined_call_operand.hbm [shape: bf16[128,384], index: 2, kind: input, shape index: {}]   ;;  %s2466_s3 = inlined_call_operand.hbm [shape: f32[1,384], index: 3, kind: input, shape index: {}]   ;;  %s2467_s4 = inlined_call_operand.vmem [shape: f32[1,128], index: 4, kind: input, shape index: {}]   ;;  %s2468_s5 = inlined_call_operand.hbm [shape: bf16[128,128], index: 5, kind: input, shape index: {}]   ;;  %s2469_s6 = inlined_call_operand.vmem [shape: f32[1,128], index: 6, kind: input, shape index: {}]   ;;  %s2470_s7 = inlined_call_operand.hbm [shape: f32[8,128], index: 7, kind: output, shape index: {}]  }
   0x1   :  { %13 = vsyncpa [#allocation9], 0 }
   0x2   :  { %14 = vsyncpa [#allocation12], 0 }
   0x3   :  { %15 = vsyncpa [#allocation7], 0  ;;  %s33_s26 = sshll.u32 %s2465_s2, 4  ;;  %s2021_s27 = smov [#allocation8]   ;;  %s34_s26 = int_to_ptr.hbm [resolvable:$true] %s33_s26 }
   0x4   :  { %s35_s28 = sshll.u32 %s2021_s27, 4  ;;  %s20_s8 = sshll.u32 %s2464_s1, 4  ;;  %s36_s28 = int_to_ptr.vmem [resolvable:$true] %s35_s28  ;;  %s21_s8 = int_to_ptr.hbm [resolvable:$true] %s20_s8 }
   0x5   :  { %s2022_s9 = smov 192   ;;  %s2023_s10 = smov 12  }
   0x6   :  { %41 = dma.hbm_to_vmem [thread:$0]  %s34_s26, 3072, %s36_s28, [#allocation9], %s2022_s9, %s2022_s9, %s2023_s10  }
   0x7   :  { %s2024_s11 = smov [#allocation5]   ;;  %s47_s15 = sshll.u32 %s2466_s3, 4  ;;  %s48_s15 = int_to_ptr.hbm [resolvable:$true] %s47_s15 }
   0x8   :  { %s22_s12 = sshll.u32 %s2024_s11, 4  ;;  %s59_s17 = sshll.u32 %s2468_s5, 4  ;;  %s23_s12 = int_to_ptr.vmem [resolvable:$true] %s22_s12  ;;  %s60_s17 = int_to_ptr.hbm [resolvable:$true] %s59_s17 }
   0x9   :  { %28 = dma.hbm_to_vmem [thread:$0]  %s21_s8, 3072, %s23_s12, [#allocation6], %s2022_s9, %s2022_s9, %s2023_s10  }
   0xa   :  { %s2025_s18 = smov [#allocation10]   ;;  %s2026_s1 = smov [#allocation11]  }
   0xb   :  { %s49_s19 = sshll.u32 %s2025_s18, 4  ;;  %s61_s20 = sshll.u32 %s2026_s1, 4  ;;  %s50_s19 = int_to_ptr.vmem [resolvable:$true] %s49_s19  ;;  %s62_s20 = int_to_ptr.vmem [resolvable:$true] %s61_s20 }
   0xc   :  { %52 = dma.hbm_to_vmem [thread:$0]  %s48_s15, 48, %s50_s19, [#allocation9]  }
   0xd   :  { %s2027_s21 = smov 64   ;;  %s2028_s22 = smov 4  }
   0xe   :  { %67 = dma.hbm_to_vmem [thread:$0]  %s60_s17, 1024, %s62_s20, [#allocation12], %s2027_s21, %s2027_s21, %s2028_s22  }
   0xf   :  { %2011 = dma.done.wait [#allocation6], 3072  }
  0x10   :  { %2012 = vsyncadd [#allocation6], 4294964224 }
  0x11   :  { %2013 = dma.done.wait [#allocation9], 3120  }
  0x12   :  { %2014 = vsyncadd [#allocation9], 4294964176 }
  0x13   :  { %2015 = dma.done.wait [#allocation12], 1024  }
  0x14   :  { %2016 = vsyncadd [#allocation12], 4294966272  ;;  %s97_s5 = sshll.u32 %s2463_s0, 4  ;;  %s2029_s24 = smov [#allocation2]   ;;  %s98_s5 = int_to_ptr.hbm [resolvable:$true] %s97_s5 }
  0x15   :  { %s99_s25 = sshll.u32 %s2029_s24, 4  ;;  %s100_s25 = int_to_ptr.vmem [resolvable:$true] %s99_s25 }
  0x16   :  { %102 = dma.hbm_to_vmem [thread:$0]  %s98_s5, 512, %s100_s25, [#allocation4] }
  0x17   :  { %2017 = dma.done.wait [#allocation4], 512 }
  0x18   :  { %2018 = vsyncadd [#allocation4], 4294966784  ;;  %v1557_v0 = vld [vmem:[#allocation5 + $0xa8] sm:$0xf]  ;;  %v1739_v1 = vld [vmem:[#allocation5 + $0xb0] sm:$0xf0] }
  0x19   :  { %v1653_v2 = vld [vmem:[#allocation8 + $0xa8] sm:$0xf]  ;;  %v1558_v3 = vor.u32 %v1739_v1, %v1557_v0  ;;  %v1763_v4 = vld [vmem:[#allocation8 + $0xb0] sm:$0xf0]  ;;  %v1545_v5 = vld [vmem:[#allocation5 + $0x90] sm:$0xf] }
  0x1a   :  { %v1736_v6 = vld [vmem:[#allocation5 + $0x98] sm:$0xf0]  ;;  %v2087_v7 = vor.u32 %v1763_v4, %v1653_v2  ;;  %v1641_v8 = vld [vmem:[#allocation8 + $0x90] sm:$0xf]  ;;  %v1533_v12 = vld [vmem:[#allocation5 + $0x78] sm:$0xf] }
  0x1b   :  { %v1760_v9 = vld [vmem:[#allocation8 + $0x98] sm:$0xf0]  ;;  %307 = vmatpush.bf16.msra.mxu0 %v1558_v3  ;;  %v1546_v10 = vor.u32 %v1736_v6, %v1545_v5  ;;  %v1733_v13 = vld [vmem:[#allocation5 + $0x80] sm:$0xf0]  ;;  %v1629_v14 = vld [vmem:[#allocation8 + $0x78] sm:$0xf] }
  0x1c   :  { %582 = vmatpush.bf16.msra.mxu3 %v2087_v7  ;;  %v2090_v11 = vor.u32 %v1760_v9, %v1641_v8  ;;  %v1757_v15 = vld [vmem:[#allocation8 + $0x80] sm:$0xf0]  ;;  %v1534_v16 = vor.u32 %v1733_v13, %v1533_v12  ;;  %v1521_v18 = vld [vmem:[#allocation5 + $0x60] sm:$0xf]  ;;  %v1730_v19 = vld [vmem:[#allocation5 + $0x68] sm:$0xf0] }
  0x1d   :  { %v2093_v17 = vor.u32 %v1757_v15, %v1629_v14  ;;  %v1617_v20 = vld [vmem:[#allocation8 + $0x60] sm:$0xf]  ;;  %v1754_v21 = vld [vmem:[#allocation8 + $0x68] sm:$0xf0]  ;;  %v1522_v22 = vor.u32 %v1730_v19, %v1521_v18  ;;  %v1509_v23 = vld [vmem:[#allocation5 + $0x48] sm:$0xf] }
  0x1e   :  { %v2096_v24 = vor.u32 %v1754_v21, %v1617_v20  ;;  %v1727_v25 = vld [vmem:[#allocation5 + $0x50] sm:$0xf0]  ;;  %v1738_v26 = vld [vmem:[#allocation5 + $0xac] sm:$0xf]  ;;  %v1559_v27 = vld [vmem:[#allocation5 + $0xb4] sm:$0xf0] }
  0x1f   :  { %308 = vmatpush.bf16.msra.mxu0 %v1546_v10  ;;  %v1605_v28 = vld [vmem:[#allocation8 + $0x48] sm:$0xf]  ;;  %v1751_v29 = vld [vmem:[#allocation8 + $0x50] sm:$0xf0]  ;;  %v1562_v30 = vor.u32 %v1738_v26, %v1559_v27  ;;  %v1547_v32 = vld [vmem:[#allocation5 + $0x9c] sm:$0xf0]  ;;  %v1510_v33 = vor.u32 %v1727_v25, %v1509_v23 }
  0x20   :  { %583 = vmatpush.bf16.msra.mxu3 %v2090_v11  ;;  %v1735_v31 = vld [vmem:[#allocation5 + $0x94] sm:$0xf]  ;;  %v1497_v34 = vld [vmem:[#allocation5 + $0x30] sm:$0xf]  ;;  %v2099_v36 = vor.u32 %v1751_v29, %v1605_v28  ;;  %v1724_v37 = vld [vmem:[#allocation5 + $0x38] sm:$0xf0] }
  0x21   :  { %336 = vmatpush.bf16.msra.mxu1 %v1562_v30  ;;  %v1550_v35 = vor.u32 %v1735_v31, %v1547_v32  ;;  %v1732_v38 = vld [vmem:[#allocation5 + $0x7c] sm:$0xf]  ;;  %v1535_v39 = vld [vmem:[#allocation5 + $0x84] sm:$0xf0]  ;;  %v1593_v40 = vld [vmem:[#allocation8 + $0x30] sm:$0xf]  ;;  %v1498_v42 = vor.u32 %v1724_v37, %v1497_v34 }
  0x22   :  { %v1748_v41 = vld [vmem:[#allocation8 + $0x38] sm:$0xf0]  ;;  %v1485_v43 = vld [vmem:[#allocation5 + $0x18] sm:$0xf]  ;;  %v1721_v44 = vld [vmem:[#allocation5 + $0x20] sm:$0xf0]  ;;  %v1538_v46 = vor.u32 %v1732_v38, %v1535_v39 }
  0x23   :  { %309 = vmatpush.bf16.msra.mxu0 %v1534_v16  ;;  %v1581_v45 = vld [vmem:[#allocation8 + $0x18] sm:$0xf]  ;;  %v2102_v47 = vor.u32 %v1748_v41, %v1593_v40  ;;  %v1729_v48 = vld [vmem:[#allocation5 + $0x64] sm:$0xf]  ;;  %v1523_v49 = vld [vmem:[#allocation5 + $0x6c] sm:$0xf0]  ;;  %v1486_v55 = vor.u32 %v1721_v44, %v1485_v43 }
  0x24   :  { %584 = vmatpush.bf16.msra.mxu3 %v2093_v17  ;;  %v1745_v50 = vld [vmem:[#allocation8 + $0x20] sm:$0xf0]  ;;  %v1565_v51 = vld [vmem:[#allocation5 + $0xb0] sm:$0xf]  ;;  %v1740_v52 = vld [vmem:[#allocation5 + $0xb8] sm:$0xf0]  ;;  %v1526_v58 = vor.u32 %v1729_v48, %v1523_v49 }
  0x25   :  { %337 = vmatpush.bf16.msra.mxu1 %v1550_v35  ;;  %v1473_v53 = vld [vmem:[#allocation5] sm:$0xf]  ;;  %v1566_v54 = vor.u32 %v1740_v52, %v1565_v51  ;;  %v1718_v56 = vld [vmem:[#allocation5 + $0x8] sm:$0xf0]  ;;  %v2105_v59 = vor.u32 %v1745_v50, %v1581_v45  ;;  %v1511_v62 = vld [vmem:[#allocation5 + $0x54] sm:$0xf0] }
  0x26   :  { %v1569_v57 = vld [vmem:[#allocation8] sm:$0xf]  ;;  %v1742_v60 = vld [vmem:[#allocation8 + $0x8] sm:$0xf0]  ;;  %v1661_v63 = vld [vmem:[#allocation8 + $0xb0] sm:$0xf]  ;;  %v1474_v5 = vor.u32 %v1718_v56, %v1473_v53 }
  0x27   :  { %310 = vmatpush.bf16.msra.mxu0 %v1522_v22  ;;  %v1726_v61 = vld [vmem:[#allocation5 + $0x4c] sm:$0xf]  ;;  %365 = vmatpush.bf16.msra.mxu2 %v1566_v54  ;;  %v1764_v0 = vld [vmem:[#allocation8 + $0xb8] sm:$0xf0]  ;;  %v1553_v1 = vld [vmem:[#allocation5 + $0x98] sm:$0xf]  ;;  %v2108_v9 = vor.u32 %v1742_v60, %v1569_v57 }
  0x28   :  { %585 = vmatpush.bf16.msra.mxu3 %v2096_v24  ;;  %v1762_v2 = vld [vmem:[#allocation8 + $0xac] sm:$0xf]  ;;  %v1655_v3 = vld [vmem:[#allocation8 + $0xb4] sm:$0xf0]  ;;  %v1737_v4 = vld [vmem:[#allocation5 + $0xa0] sm:$0xf0]  ;;  %v1514_v6 = vor.u32 %v1726_v61, %v1511_v62  ;;  %v2110_v10 = vor.u32 %v1764_v0, %v1661_v63 }
  0x29   :  { %338 = vmatpush.bf16.msra.mxu1 %v1538_v46  ;;  %v1554_v8 = vor.u32 %v1737_v4, %v1553_v1  ;;  %v1649_v12 = vld [vmem:[#allocation8 + $0x98] sm:$0xf]  ;;  %v1723_v13 = vld [vmem:[#allocation5 + $0x34] sm:$0xf]  ;;  %v1499_v14 = vld [vmem:[#allocation5 + $0x3c] sm:$0xf0]  ;;  %v2112_v15 = vor.u32 %v1762_v2, %v1655_v3 }
  0x2a   :  { %v1761_v16 = vld [vmem:[#allocation8 + $0xa0] sm:$0xf0]  ;;  %v1541_v18 = vld [vmem:[#allocation5 + $0x80] sm:$0xf]  ;;  %v1734_v19 = vld [vmem:[#allocation5 + $0x88] sm:$0xf0]  ;;  %v1502_v25 = vor.u32 %v1723_v13, %v1499_v14 }
  0x2b   :  { %311 = vmatpush.bf16.msra.mxu0 %v1510_v33  ;;  %366 = vmatpush.bf16.msra.mxu2 %v1554_v8  ;;  %v2114_v20 = vld [vmem:[#allocation2] sm:$0xff]  ;;  %v1759_v21 = vld [vmem:[#allocation8 + $0x94] sm:$0xf]  ;;  %v1542_v23 = vor.u32 %v1734_v19, %v1541_v18  ;;  %v2118_v26 = vor.u32 %v1761_v16, %v1649_v12  ;;  %v1720_v28 = vld [vmem:[#allocation5 + $0x1c] sm:$0xf]  ;;  %v2030_v39 = vmov 0  }
  0x2c   :  { %586 = vmatpush.bf16.msra.mxu3 %v2099_v36  ;;  %v1643_v22 = vld [vmem:[#allocation8 + $0x9c] sm:$0xf0]  ;;  %v1487_v29 = vld [vmem:[#allocation5 + $0x24] sm:$0xf0]  ;;  %v1758_v31 = vld [vmem:[#allocation8 + $0x88] sm:$0xf0] }
  0x2d   :  { %339 = vmatpush.bf16.msra.mxu1 %v1526_v58  ;;  %v1637_v27 = vld [vmem:[#allocation8 + $0x80] sm:$0xf]  ;;  %v2121_v30 = vor.u32 %v1759_v21, %v1643_v22  ;;  %v1529_v32 = vld [vmem:[#allocation5 + $0x68] sm:$0xf]  ;;  %v1731_v33 = vld [vmem:[#allocation5 + $0x70] sm:$0xf0]  ;;  %v1490_v40 = vor.u32 %v1720_v28, %v1487_v29 }
  0x2e   :  { %v1756_v34 = vld [vmem:[#allocation8 + $0x7c] sm:$0xf]  ;;  %v1631_v35 = vld [vmem:[#allocation8 + $0x84] sm:$0xf0]  ;;  %v1530_v37 = vor.u32 %v1731_v33, %v1529_v32  ;;  %v1517_v38 = vld [vmem:[#allocation5 + $0x50] sm:$0xf] }
  0x2f   :  { %312 = vmatpush.bf16.msra.mxu0 %v1498_v42  ;;  %367 = vmatpush.bf16.msra.mxu2 %v1542_v23  ;;  %v1728_v41 = vld [vmem:[#allocation5 + $0x58] sm:$0xf0]  ;;  %v2126_v42 = vor.u32 %v1758_v31, %v1637_v27  ;;  %v1717_v43 = vld [vmem:[#allocation5 + $0x4] sm:$0xf]  ;;  %v1475_v44 = vld [vmem:[#allocation5 + $0xc] sm:$0xf0]  ;;  %v2129_v45 = vor.u32 %v1756_v34, %v1631_v35 }
  0x30   :  { %587 = vmatpush.bf16.msra.mxu3 %v2102_v47  ;;  %v1753_v46 = vld [vmem:[#allocation8 + $0x64] sm:$0xf]  ;;  %v1625_v48 = vld [vmem:[#allocation8 + $0x68] sm:$0xf]  ;;  %v1755_v49 = vld [vmem:[#allocation8 + $0x70] sm:$0xf0]  ;;  %v1518_v50 = vor.u32 %v1728_v41, %v1517_v38  ;;  %v1478_v54 = vor.u32 %v1717_v43, %v1475_v44 }
  0x31   :  { %340 = vmatpush.bf16.msra.mxu1 %v1514_v6  ;;  %v1619_v51 = vld [vmem:[#allocation8 + $0x6c] sm:$0xf0]  ;;  %v1505_v52 = vld [vmem:[#allocation5 + $0x38] sm:$0xf]  ;;  %v1725_v53 = vld [vmem:[#allocation5 + $0x40] sm:$0xf0] }
  0x32   :  { %v2135_v56 = vor.u32 %v1753_v46, %v1619_v51  ;;  %v1750_v57 = vld [vmem:[#allocation8 + $0x4c] sm:$0xf]  ;;  %v1613_v58 = vld [vmem:[#allocation8 + $0x50] sm:$0xf]  ;;  %v1752_v60 = vld [vmem:[#allocation8 + $0x58] sm:$0xf0]  ;;  %v1506_v61 = vor.u32 %v1725_v53, %v1505_v52 }
  0x33   :  { %313 = vmatpush.bf16.msra.mxu0 %v1486_v55  ;;  %368 = vmatpush.bf16.msra.mxu2 %v1530_v37  ;;  %v2132_v55 = vor.u32 %v1755_v49, %v1625_v48  ;;  %v1607_v62 = vld [vmem:[#allocation8 + $0x54] sm:$0xf0]  ;;  %v1493_v63 = vld [vmem:[#allocation5 + $0x20] sm:$0xf]  ;;  %v1722_v0 = vld [vmem:[#allocation5 + $0x28] sm:$0xf0]  ;;  %v2138_v1 = vor.u32 %v1752_v60, %v1613_v58 }
  0x34   :  { %588 = vmatpush.bf16.msra.mxu3 %v2105_v59  ;;  %v2142_v2 = vor.u32 %v1750_v57, %v1607_v62  ;;  %v1601_v3 = vld [vmem:[#allocation8 + $0x38] sm:$0xf]  ;;  %v1749_v4 = vld [vmem:[#allocation8 + $0x40] sm:$0xf0]  ;;  %v1714_v6 = vld [vmem:[#allocation2 + $0x8] sm:$0xff]  ;;  %s2031_s30 = smov [#allocation13]  }
  0x35   :  { %341 = vmatpush.bf16.msra.mxu1 %v1502_v25  ;;  %v1747_v8 = vld [vmem:[#allocation8 + $0x34] sm:$0xf]  ;;  %v1595_v12 = vld [vmem:[#allocation8 + $0x3c] sm:$0xf0]  ;;  %v2146_v13 = vor.u32 %v1749_v4, %v1601_v3  ;;  %v1744_v16 = vld [vmem:[#allocation8 + $0x1c] sm:$0xf] }
  0x36   :  { %v2150_v14 = vor.u32 %v1747_v8, %v1595_v12  ;;  %v1481_v18 = vld [vmem:[#allocation5 + $0x8] sm:$0xf]  ;;  %v1719_v19 = vld [vmem:[#allocation5 + $0x10] sm:$0xf0]  ;;  %v1589_v22 = vld [vmem:[#allocation8 + $0x20] sm:$0xf] }
  0x37   :  { %314 = vmatpush.bf16.msra.mxu0 %v1474_v5  ;;  %369 = vmatpush.bf16.msra.mxu2 %v1518_v50  ;;  %v1494_v5 = vor.u32 %v1722_v0, %v1493_v63  ;;  %v1583_v21 = vld [vmem:[#allocation8 + $0x24] sm:$0xf0]  ;;  %v1746_v23 = vld [vmem:[#allocation8 + $0x28] sm:$0xf0]  ;;  %v1482_v25 = vor.u32 %v1719_v19, %v1481_v18  ;;  %v1743_v31 = vld [vmem:[#allocation8 + $0x10] sm:$0xf0] }
  0x38   :  { %589 = vmatpush.bf16.msra.mxu3 %v2108_v9  ;;  %v2153_v27 = vor.u32 %v1746_v23, %v1589_v22  ;;  %v2157_v28 = vor.u32 %v1744_v16, %v1583_v21  ;;  %v1577_v29 = vld [vmem:[#allocation8 + $0x8] sm:$0xf]  ;;  %v1741_v32 = vld [vmem:[#allocation8 + $0x4] sm:$0xf]  ;;  %v1571_v33 = vld [vmem:[#allocation8 + $0xc] sm:$0xf0] }
  0x39   :  { %342 = vmatpush.bf16.msra.mxu1 %v1490_v40  ;;  %v2162_v34 = vor.u32 %v1743_v31, %v1577_v29  ;;  %v2165_v35 = vor.u32 %v1741_v32, %v1571_v33  ;;  %v1715_v37 = vld [vmem:[#allocation2 + $0x10] sm:$0xff]  ;;  %s1421_s8 = sshll.u32 %s2031_s30, 4  ;;  %s1423_s11 = sshll.u32 %s2470_s7, 4  ;;  %s1422_s8 = int_to_ptr.vmem [resolvable:$true] %s1421_s8  ;;  %s1424_s11 = int_to_ptr.hbm [resolvable:$true] %s1423_s11 }
  0x3a   :  { %315 = vmatmul.bf16.vlgmr.msra.gmra.mxu0 %v2114_v20 }
  0x3b   :  { %608 = vmatpush.bf16.msrb.mxu0 %v2110_v10  ;;  %590 = vmatmul.bf16.vlgmr.msra.gmra.mxu3 %v2030_v39 }
  0x3c   :  { %595 = vmatpush.bf16.msrb.mxu3 %v2112_v15  ;;  %370 = vmatpush.bf16.msra.mxu2 %v1506_v61 }
  0x3d   :  { %343 = vmatpush.bf16.msra.mxu1 %v1478_v54 }
  0x3f   :  { %609 = vmatpush.bf16.msrb.mxu0 %v2118_v26 }
  0x40   :  { %596 = vmatpush.bf16.msrb.mxu3 %v2121_v30  ;;  %344 = vmatmul.bf16.vlgmr.msra.gmra.mxu1 %v2114_v20 }
  0x41   :  { %676 = vmatpush.bf16.msrb.mxu1 %v2087_v7  ;;  %371 = vmatpush.bf16.msra.mxu2 %v1494_v5 }
  0x43   :  { %610 = vmatpush.bf16.msrb.mxu0 %v2126_v42 }
  0x44   :  { %597 = vmatpush.bf16.msrb.mxu3 %v2129_v45 }
  0x45   :  { %677 = vmatpush.bf16.msrb.mxu1 %v2090_v11  ;;  %372 = vmatpush.bf16.msra.mxu2 %v1482_v25 }
  0x47   :  { %611 = vmatpush.bf16.msrb.mxu0 %v2132_v55 }
  0x48   :  { %598 = vmatpush.bf16.msrb.mxu3 %v2135_v56  ;;  %373 = vmatmul.bf16.vlgmr.msra.gmra.mxu2 %v2114_v20  ;;  %v1716_v20 = vld [vmem:[#allocation2 + $0x18] sm:$0xff] }
  0x49   :  { %678 = vmatpush.bf16.msrb.mxu1 %v2093_v17  ;;  %689 = vmatpush.bf16.msrb.mxu2 %v2112_v15 }
  0x4a   :  { %320 = vmatmul.bf16.gmra.mxu0 %v1714_v6 }
  0x4b   :  { %612 = vmatpush.bf16.msrb.mxu0 %v2138_v1 }
  0x4c   :  { %599 = vmatpush.bf16.msrb.mxu3 %v2142_v2 }
  0x4d   :  { %679 = vmatpush.bf16.msrb.mxu1 %v2096_v24  ;;  %690 = vmatpush.bf16.msrb.mxu2 %v2121_v30 }
  0x4f   :  { %613 = vmatpush.bf16.msrb.mxu0 %v2146_v13 }
  0x50   :  { %600 = vmatpush.bf16.msrb.mxu3 %v2150_v14  ;;  %349 = vmatmul.bf16.gmra.mxu1 %v1714_v6 }
  0x51   :  { %680 = vmatpush.bf16.msrb.mxu1 %v2099_v36  ;;  %691 = vmatpush.bf16.msrb.mxu2 %v2129_v45 }
  0x53   :  { %614 = vmatpush.bf16.msrb.mxu0 %v2153_v27 }
  0x54   :  { %601 = vmatpush.bf16.msrb.mxu3 %v2157_v28 }
  0x55   :  { %681 = vmatpush.bf16.msrb.mxu1 %v2102_v47  ;;  %692 = vmatpush.bf16.msrb.mxu2 %v2135_v56 }
  0x57   :  { %615 = vmatpush.bf16.msrb.mxu0 %v2162_v34 }
  0x58   :  { %602 = vmatpush.bf16.msrb.mxu3 %v2165_v35  ;;  %378 = vmatmul.bf16.gmra.mxu2 %v1714_v6 }
  0x59   :  { %682 = vmatpush.bf16.msrb.mxu1 %v2105_v59  ;;  %693 = vmatpush.bf16.msrb.mxu2 %v2142_v2 }
  0x5a   :  { %325 = vmatmul.bf16.gmra.mxu0 %v1715_v37 }
  0x5b   :  { %770 = vmatpush.bf16.msra.mxu0 %v2087_v7  ;;  %603 = vmatmul.bf16.vlgmr.msrb.gmra.mxu3 %v2030_v39 }
  0x5c   :  { %702 = vmatpush.bf16.msra.mxu3 %v2110_v10 }
  0x5d   :  { %683 = vmatpush.bf16.msrb.mxu1 %v2108_v9  ;;  %694 = vmatpush.bf16.msrb.mxu2 %v2150_v14 }
  0x5f   :  { %771 = vmatpush.bf16.msra.mxu0 %v2090_v11 }
  0x60   :  { %703 = vmatpush.bf16.msra.mxu3 %v2118_v26  ;;  %354 = vmatmul.bf16.gmra.mxu1 %v1715_v37 }
  0x61   :  { %783 = vmatpush.bf16.msra.mxu1 %v2112_v15  ;;  %695 = vmatpush.bf16.msrb.mxu2 %v2157_v28 }
  0x63   :  { %772 = vmatpush.bf16.msra.mxu0 %v2093_v17 }
  0x64   :  { %704 = vmatpush.bf16.msra.mxu3 %v2126_v42 }
  0x65   :  { %784 = vmatpush.bf16.msra.mxu1 %v2121_v30  ;;  %696 = vmatpush.bf16.msrb.mxu2 %v2165_v35 }
  0x67   :  { %773 = vmatpush.bf16.msra.mxu0 %v2096_v24 }
  0x68   :  { %705 = vmatpush.bf16.msra.mxu3 %v2132_v55  ;;  %383 = vmatmul.bf16.gmra.mxu2 %v1715_v37 }
  0x69   :  { %796 = vmatpush.bf16.msra.mxu2 %v2110_v10  ;;  %785 = vmatpush.bf16.msra.mxu1 %v2129_v45 }
  0x6a   :  { %330 = vmatmul.bf16.gmra.mxu0 %v1716_v20 }
  0x6b   :  { %774 = vmatpush.bf16.msra.mxu0 %v2099_v36 }
  0x6c   :  { %706 = vmatpush.bf16.msra.mxu3 %v2138_v1 }
  0x6d   :  { %797 = vmatpush.bf16.msra.mxu2 %v2118_v26  ;;  %786 = vmatpush.bf16.msra.mxu1 %v2135_v56 }
  0x6f   :  { %775 = vmatpush.bf16.msra.mxu0 %v2102_v47 }
  0x70   :  { %707 = vmatpush.bf16.msra.mxu3 %v2146_v13  ;;  %359 = vmatmul.bf16.gmra.mxu1 %v1716_v20 }
  0x71   :  { %798 = vmatpush.bf16.msra.mxu2 %v2126_v42  ;;  %787 = vmatpush.bf16.msra.mxu1 %v2142_v2 }
  0x73   :  { %776 = vmatpush.bf16.msra.mxu0 %v2105_v59 }
  0x74   :  { %708 = vmatpush.bf16.msra.mxu3 %v2153_v27 }
  0x75   :  { %799 = vmatpush.bf16.msra.mxu2 %v2132_v55  ;;  %788 = vmatpush.bf16.msra.mxu1 %v2150_v14 }
  0x77   :  { %777 = vmatpush.bf16.msra.mxu0 %v2108_v9 }
  0x78   :  { %709 = vmatpush.bf16.msra.mxu3 %v2162_v34  ;;  %388 = vmatmul.bf16.gmra.mxu2 %v1716_v20 }
  0x79   :  { %800 = vmatpush.bf16.msra.mxu2 %v2138_v1  ;;  %789 = vmatpush.bf16.msra.mxu1 %v2157_v28 }
  0x7a   :  { %616 = vmatmul.bf16.vlgmr.msrb.gmra.mxu0 %v2030_v39  ;;  %v147_v39 = vld [vmem:[#allocation10] sm:$0x7] }
  0x7b   :  { %877 = vmatpush.bf16.msrb.mxu0 %v2112_v15  ;;  %v149_v40 = vperm.slane %v147_v39, 0  ;;  %v2237_v57 = vperm.slane %v147_v39, 1 }
  0x7c   :  { %864 = vmatpush.bf16.msrb.mxu3 %v2087_v7 }
  0x7d   :  { %801 = vmatpush.bf16.msra.mxu2 %v2146_v13  ;;  %790 = vmatpush.bf16.msra.mxu1 %v2165_v35 }
  0x7f   :  { %878 = vmatpush.bf16.msrb.mxu0 %v2121_v30 }
  0x80   :  { %865 = vmatpush.bf16.msrb.mxu3 %v2090_v11 }
  0x81   :  { %802 = vmatpush.bf16.msra.mxu2 %v2153_v27 }
  0x83   :  { %879 = vmatpush.bf16.msrb.mxu0 %v2129_v45 }
  0x84   :  { %866 = vmatpush.bf16.msrb.mxu3 %v2093_v17 }
  0x85   :  { %803 = vmatpush.bf16.msra.mxu2 %v2162_v34 }
  0x87   :  { %880 = vmatpush.bf16.msrb.mxu0 %v2135_v56 }
  0x88   :  { %867 = vmatpush.bf16.msrb.mxu3 %v2096_v24 }
  0x8b   :  { %881 = vmatpush.bf16.msrb.mxu0 %v2142_v2 }
  0x8c   :  { %868 = vmatpush.bf16.msrb.mxu3 %v2099_v36 }
  0x8f   :  { %882 = vmatpush.bf16.msrb.mxu0 %v2150_v14 }
  0x90   :  { %869 = vmatpush.bf16.msrb.mxu3 %v2102_v47 }
  0x93   :  { %883 = vmatpush.bf16.msrb.mxu0 %v2157_v28 }
  0x94   :  { %870 = vmatpush.bf16.msrb.mxu3 %v2105_v59 }
  0x97   :  { %884 = vmatpush.bf16.msrb.mxu0 %v2165_v35 }
  0x98   :  { %871 = vmatpush.bf16.msrb.mxu3 %v2108_v9 }
  0xb7   :  { %v316_v38 = vpop.f32.mrf.mxu0 }
  0xb8   :  { %v317_v46 = vadd.f32 %v316_v38, %v149_v40 }
  0xbd   :  { %v345_v58 = vpop.f32.mrf.mxu1 }
  0xbe   :  { %v591_v41 = vpop.f32.mrf.mxu3  ;;  %v346_v63 = vadd.f32 %v345_v58, %v2237_v57 }
  0xbf   :  { %v318_v43 = vpop.f32.mrf.mxu0  ;;  %v627_v50 = vadd.f32 %v591_v41, %v317_v46  ;;  %v2253_v46 = vld [vmem:[%s2467_s4] ss:$0 sm:$0xff] }
  0xc0   :  { %v2231_v44 = vadd.f32 %v318_v43, %v149_v40  ;;  %v2248_v43 = vperm.slane %v147_v39, 2 }
  0xc1   :  { %v1663_v52 = vmul.f32 -1.442695, %v627_v50 }
  0xc3   :  { %1786 = vpow2.f32 %v1663_v52 }
  0xc6   :  { %v593_v48 = vpop.f32.mrf.mxu3 }
  0xc7   :  { %v321_v49 = vpop.f32.mrf.mxu0 }
  0xc8   :  { %v2233_v51 = vadd.f32 %v321_v49, %v149_v40 }
  0xc9   :  { %v1787_v60 = vpop.eup %1786 }
  0xca   :  { %v631_v0 = vadd.f32 1.0, %v1787_v60 }
  0xcb   :  { %v374_v52 = vpop.f32.mrf.mxu2 }
  0xcc   :  { %1788 = vrcp.f32 %v631_v0  ;;  %v643_v41 = vand.u32 2147483648, %v631_v0  ;;  %vm637_vm1 = vweird.f32 %v631_v0  ;;  %v641_v48 = vand.u32 2147483647, %v631_v0 }
  0xcd   :  { %v375_v58 = vadd.f32 %v374_v52, %v2248_v43 }
  0xce   :  { %vm642_vm3 = vcmp.eq.f32.partialorder %v641_v48, 8.507059e+37 }
  0xcf   :  { %v323_v53 = vpop.f32.mrf.mxu0 }
  0xd0   :  { %v2235_v54 = vadd.f32 %v323_v53, %v149_v40 }
  0xd2   :  { %v1789_v12 = vpop.eup %1788 }
  0xd3   :  { %v633_v19 = vmul.f32 %v1789_v12, %v631_v0  ;;  %vm638_vm0 = vweird.f32 %v1789_v12 }
  0xd4   :  { %vm639_vm2 = vmor %vm637_vm1, %vm638_vm0 }
  0xd5   :  { %v634_v25 = vsub.f32 1.0, %v633_v19 }
  0xd7   :  { %v326_v61 = vpop.f32.mrf.mxu0  ;;  %v635_v29 = vmul.f32 %v1789_v12, %v634_v25 }
  0xd8   :  { %v2239_v62 = vadd.f32 %v326_v61, %v149_v40 }
  0xd9   :  { %v636_v38 = vadd.f32 %v1789_v12, %v635_v29 }
  0xdb   :  { %v640_v50 = vsel %vm639_vm2, %v1789_v12, %v636_v38 }
  0xde   :  { %v604_v3 = vpop.f32.mrf.mxu3 }
  0xdf   :  { %v647_v4 = vadd.f32 %v604_v3, %v346_v63  ;;  %v328_v6 = vpop.f32.mrf.mxu0 }
  0xe0   :  { %v2242_v8 = vadd.f32 %v328_v6, %v149_v40 }
  0xe1   :  { %v1664_v5 = vmul.f32 -1.442695, %v647_v4 }
  0xe3   :  { %1790 = vpow2.f32 %v1664_v5 }
  0xe6   :  { %v606_v16 = vpop.f32.mrf.mxu3 }
  0xe7   :  { %v331_v22 = vpop.f32.mrf.mxu0 }
  0xe8   :  { %v2244_v23 = vadd.f32 %v331_v22, %v149_v40 }
  0xe9   :  { %v1791_v18 = vpop.eup %1790 }
  0xea   :  { %v651_v21 = vadd.f32 1.0, %v1791_v18  ;;  %2471 = vst [vmem:[#allocation23_spill] sm:$0xff] %v2244_v23 }
  0xec   :  { %1792 = vrcp.f32 %v651_v21  ;;  %vm657_vm4 = vweird.f32 %v651_v21  ;;  %v663_v3 = vand.u32 2147483648, %v651_v21  ;;  %v661_v4 = vand.u32 2147483647, %v651_v21 }
  0xee   :  { %v664_v6 = vor.u32 1.1754944e-38, %v663_v3  ;;  %vm662_vm7 = vcmp.eq.f32.partialorder %v661_v4, 8.507059e+37 }
  0xef   :  { %v333_v32 = vpop.f32.mrf.mxu0 }
  0xf0   :  { %v2246_v37 = vadd.f32 %v333_v32, %v149_v40  ;;  %v644_v40 = vor.u32 1.1754944e-38, %v643_v41 }
  0xf2   :  { %v1793_v31 = vpop.eup %1792  ;;  %2472 = vst [vmem:[#allocation24_spill] sm:$0xff] %v2246_v37  ;;  %v645_v39 = vsel %vm642_vm3, %v644_v40, %v640_v50 }
  0xf3   :  { %v653_v33 = vmul.f32 %v1793_v31, %v651_v21  ;;  %vm658_vm5 = vweird.f32 %v1793_v31  ;;  %v347_v21 = vpop.f32.mrf.mxu1 }
  0xf4   :  { %vm659_vm6 = vmor %vm657_vm4, %vm658_vm5  ;;  %v348_v3 = vadd.f32 %v347_v21, %v2237_v57 }
  0xf5   :  { %v654_v20 = vsub.f32 1.0, %v653_v33 }
  0xf7   :  { %v655_v49 = vmul.f32 %v1793_v31, %v654_v20  ;;  %v617_v53 = vpop.f32.mrf.mxu0 }
  0xf8   :  { %v667_v60 = vadd.f32 %v2253_v46, %v617_v53 }
  0xf9   :  { %v656_v61 = vadd.f32 %v1793_v31, %v655_v49 }
  0xfa   :  { %v668_v63 = vmul.f32 %v667_v60, %v645_v39 }
  0xfb   :  { %v660_v0 = vsel %vm659_vm6, %v1793_v31, %v656_v61  ;;  %v376_v31 = vpop.f32.mrf.mxu2  ;;  %v2285_v33 = vpop.f32.mrf.mxu1 }
  0xfc   :  { %v669_v5 = vadd.f32 %v668_v63, %v375_v58  ;;  %v665_v16 = vsel %vm662_vm7, %v664_v6, %v660_v0 }
  0xfd   :  { %v671_v18 = vsub.f32 1.0, %v665_v16  ;;  %v673_v25 = vmul.f32 0.0, %v665_v16 }
  0xfe   :  { %1794 = vtanh.f32 %v669_v5 }
  0xff   :  { %v619_v12 = vpop.f32.mrf.mxu0 }
 0x103   :  { %v2287_v20 = vpop.f32.mrf.mxu2  ;;  %v2289_v38 = vpop.f32.mrf.mxu1 }
 0x104   :  { %v1795_v19 = vpop.eup %1794 }
 0x105   :  { %v672_v22 = vmul.f32 %v1795_v19, %v671_v18 }
 0x107   :  { %v2257_v29 = vadd.f32 %v673_v25, %v672_v22 }
 0x109   :  { %v675_v32 = vpack.c.bf16 %v2257_v29, %v2257_v29 }
 0x10b   :  { %684 = vmatmul.bf16.vlgmr.msrb.gmra.mxu1 %v675_v32  ;;  %697 = vmatmul.bf16.vlgmr.msrb.gmra.mxu2 %v675_v32  ;;  %v2291_v41 = vpop.f32.mrf.mxu2  ;;  %v2293_v48 = vpop.f32.mrf.mxu1 }
 0x10c   :  { %710 = vmatmul.bf16.vlgmr.msra.gmra.mxu3 %v675_v32  ;;  %890 = vmatpush.bf16.msrb.mxu1 %v2110_v10 }
 0x10d   :  { %958 = vmatpush.bf16.msrb.mxu2 %v2087_v7  ;;  %971 = vmatpush.bf16.msra.mxu3 %v2112_v15 }
 0x110   :  { %891 = vmatpush.bf16.msrb.mxu1 %v2118_v26 }
 0x111   :  { %959 = vmatpush.bf16.msrb.mxu2 %v2090_v11  ;;  %972 = vmatpush.bf16.msra.mxu3 %v2121_v30 }
 0x113   :  { %v2295_v49 = vpop.f32.mrf.mxu2  ;;  %v2297_v50 = vpop.f32.mrf.mxu1 }
 0x114   :  { %892 = vmatpush.bf16.msrb.mxu1 %v2126_v42 }
 0x115   :  { %960 = vmatpush.bf16.msrb.mxu2 %v2093_v17  ;;  %973 = vmatpush.bf16.msra.mxu3 %v2129_v45 }
 0x118   :  { %893 = vmatpush.bf16.msrb.mxu1 %v2132_v55 }
 0x119   :  { %961 = vmatpush.bf16.msrb.mxu2 %v2096_v24  ;;  %974 = vmatpush.bf16.msra.mxu3 %v2135_v56 }
 0x11b   :  { %v2299_v52 = vpop.f32.mrf.mxu2  ;;  %v2301_v53 = vpop.f32.mrf.mxu1 }
 0x11c   :  { %894 = vmatpush.bf16.msrb.mxu1 %v2138_v1 }
 0x11d   :  { %962 = vmatpush.bf16.msrb.mxu2 %v2099_v36  ;;  %975 = vmatpush.bf16.msra.mxu3 %v2142_v2 }
 0x120   :  { %895 = vmatpush.bf16.msrb.mxu1 %v2146_v13 }
 0x121   :  { %963 = vmatpush.bf16.msrb.mxu2 %v2102_v47  ;;  %976 = vmatpush.bf16.msra.mxu3 %v2150_v14 }
 0x123   :  { %v2303_v40 = vpop.f32.mrf.mxu2  ;;  %v2305_v58 = vpop.f32.mrf.mxu1 }
 0x124   :  { %896 = vmatpush.bf16.msrb.mxu1 %v2153_v27  ;;  %2473 = vst [vmem:[#allocation25_spill] sm:$0xff] %v2303_v40 }
 0x125   :  { %964 = vmatpush.bf16.msrb.mxu2 %v2105_v59  ;;  %977 = vmatpush.bf16.msra.mxu3 %v2157_v28  ;;  %2474 = vst [vmem:[#allocation26_spill] sm:$0xff] %v2305_v58 }
 0x128   :  { %897 = vmatpush.bf16.msrb.mxu1 %v2162_v34 }
 0x129   :  { %965 = vmatpush.bf16.msrb.mxu2 %v2108_v9  ;;  %978 = vmatpush.bf16.msra.mxu3 %v2165_v35 }
 0x12b   :  { %v2307_v60 = vpop.f32.mrf.mxu2 }
 0x12c   :  { %2475 = vst [vmem:[#allocation27_spill] sm:$0xff] %v2307_v60 }
 0x188   :  { %v685_v39 = vpop.f32.mrf.mxu1 }
 0x189   :  { %v721_v61 = vadd.f32 %v685_v39, %v2231_v44 }
 0x18b   :  { %v1665_v63 = vmul.f32 -1.442695, %v721_v61 }
 0x18d   :  { %1796 = vpow2.f32 %v1665_v63 }
 0x18e   :  { %v698_v4 = vpop.f32.mrf.mxu2 }
 0x18f   :  { %v741_v5 = vadd.f32 %v698_v4, %v348_v3  ;;  %v711_v0 = vpop.f32.mrf.mxu3 }
 0x190   :  { %v687_v6 = vpop.f32.mrf.mxu1 }
 0x191   :  { %v1666_v12 = vmul.f32 -1.442695, %v741_v5 }
 0x193   :  { %v1797_v16 = vpop.eup %1796  ;;  %1798 = vpow2.f32 %v1666_v12 }
 0x194   :  { %v725_v18 = vadd.f32 1.0, %v1797_v16 }
 0x196   :  { %1800 = vrcp.f32 %v725_v18  ;;  %v700_v19 = vpop.f32.mrf.mxu2  ;;  %v737_v61 = vand.u32 2147483648, %v725_v18  ;;  %v735_v63 = vand.u32 2147483647, %v725_v18  ;;  %vm731_vm9 = vweird.f32 %v725_v18 }
 0x197   :  { %v713_v22 = vpop.f32.mrf.mxu3  ;;  %v761_v19 = vadd.f32 %v2253_v46, %v711_v0 }
 0x198   :  { %v738_v5 = vor.u32 1.1754944e-38, %v737_v61  ;;  %vm736_vm11 = vcmp.eq.f32.partialorder %v735_v63, 8.507059e+37  ;;  %v377_v22 = vadd.f32 %v376_v31, %v2248_v43 }
 0x199   :  { %v1799_v25 = vpop.eup %1798 }
 0x19a   :  { %v745_v32 = vadd.f32 1.0, %v1799_v25 }
 0x19c   :  { %v1801_v60 = vpop.eup %1800  ;;  %1802 = vrcp.f32 %v745_v32  ;;  %v755_v58 = vand.u32 2147483647, %v745_v32  ;;  %vm751_vm13 = vweird.f32 %v745_v32 }
 0x19d   :  { %v727_v44 = vmul.f32 %v1801_v60, %v725_v18  ;;  %vm732_vm8 = vweird.f32 %v1801_v60 }
 0x19e   :  { %vm733_vm10 = vmor %vm731_vm9, %vm732_vm8  ;;  %vm756_vm15 = vcmp.eq.f32.partialorder %v755_v58, 8.507059e+37 }
 0x19f   :  { %v728_v39 = vsub.f32 1.0, %v727_v44  ;;  %v757_v44 = vand.u32 2147483648, %v745_v32 }
 0x1a1   :  { %v729_v21 = vmul.f32 %v1801_v60, %v728_v39  ;;  %v758_v18 = vor.u32 1.1754944e-38, %v757_v44 }
 0x1a2   :  { %v1803_v3 = vpop.eup %1802 }
 0x1a3   :  { %v747_v4 = vmul.f32 %v1803_v3, %v745_v32  ;;  %v730_v6 = vadd.f32 %v1801_v60, %v729_v21  ;;  %vm752_vm12 = vweird.f32 %v1803_v3 }
 0x1a4   :  { %vm753_vm14 = vmor %vm751_vm13, %vm752_vm12 }
 0x1a5   :  { %v748_v12 = vsub.f32 1.0, %v747_v4  ;;  %v734_v16 = vsel %vm733_vm10, %v1801_v60, %v730_v6 }
 0x1a6   :  { %v739_v25 = vsel %vm736_vm11, %v738_v5, %v734_v16 }
 0x1a7   :  { %v749_v37 = vmul.f32 %v1803_v3, %v748_v12  ;;  %v762_v39 = vmul.f32 %v761_v19, %v739_v25 }
 0x1a9   :  { %v763_v40 = vadd.f32 %v762_v39, %v377_v22  ;;  %v750_v23 = vadd.f32 %v1803_v3, %v749_v37 }
 0x1ab   :  { %1804 = vtanh.f32 %v763_v40  ;;  %v754_v61 = vsel %vm753_vm14, %v1803_v3, %v750_v23  ;;  %v351_v23 = vadd.f32 %v2285_v33, %v2237_v57 }
 0x1ac   :  { %v759_v60 = vsel %vm756_vm15, %v758_v18, %v754_v61 }
 0x1ad   :  { %v765_v21 = vsub.f32 1.0, %v759_v60  ;;  %v767_v31 = vmul.f32 %v759_v60, %v2257_v29 }
 0x1b1   :  { %v1805_v63 = vpop.eup %1804 }
 0x1b2   :  { %v766_v0 = vmul.f32 %v1805_v63, %v765_v21 }
 0x1b4   :  { %v2314_v4 = vadd.f32 %v767_v31, %v766_v0 }
 0x1b6   :  { %v769_v6 = vpack.c.bf16 %v2314_v4, %v2314_v4 }
 0x1b8   :  { %778 = vmatmul.bf16.vlgmr.msra.gmra.mxu0 %v769_v6  ;;  %791 = vmatmul.bf16.vlgmr.msra.gmra.mxu1 %v769_v6 }
 0x1b9   :  { %804 = vmatmul.bf16.vlgmr.msra.gmra.mxu2 %v769_v6  ;;  %984 = vmatpush.bf16.msra.mxu0 %v2110_v10 }
 0x1ba   :  { %1052 = vmatpush.bf16.msra.mxu1 %v2087_v7  ;;  %1065 = vmatpush.bf16.msra.mxu2 %v2112_v15 }
 0x1bd   :  { %985 = vmatpush.bf16.msra.mxu0 %v2118_v26 }
 0x1be   :  { %1053 = vmatpush.bf16.msra.mxu1 %v2090_v11  ;;  %1066 = vmatpush.bf16.msra.mxu2 %v2121_v30 }
 0x1c1   :  { %986 = vmatpush.bf16.msra.mxu0 %v2126_v42 }
 0x1c2   :  { %1054 = vmatpush.bf16.msra.mxu1 %v2093_v17  ;;  %1067 = vmatpush.bf16.msra.mxu2 %v2129_v45 }
 0x1c5   :  { %987 = vmatpush.bf16.msra.mxu0 %v2132_v55 }
 0x1c6   :  { %1055 = vmatpush.bf16.msra.mxu1 %v2096_v24  ;;  %1068 = vmatpush.bf16.msra.mxu2 %v2135_v56 }
 0x1c9   :  { %988 = vmatpush.bf16.msra.mxu0 %v2138_v1 }
 0x1ca   :  { %1056 = vmatpush.bf16.msra.mxu1 %v2099_v36  ;;  %1069 = vmatpush.bf16.msra.mxu2 %v2142_v2 }
 0x1cd   :  { %989 = vmatpush.bf16.msra.mxu0 %v2146_v13 }
 0x1ce   :  { %1057 = vmatpush.bf16.msra.mxu1 %v2102_v47  ;;  %1070 = vmatpush.bf16.msra.mxu2 %v2150_v14 }
 0x1d1   :  { %990 = vmatpush.bf16.msra.mxu0 %v2153_v27 }
 0x1d2   :  { %1058 = vmatpush.bf16.msra.mxu1 %v2105_v59  ;;  %1071 = vmatpush.bf16.msra.mxu2 %v2157_v28 }
 0x1d5   :  { %991 = vmatpush.bf16.msra.mxu0 %v2162_v34 }
 0x1d6   :  { %1059 = vmatpush.bf16.msra.mxu1 %v2108_v9  ;;  %1072 = vmatpush.bf16.msra.mxu2 %v2165_v35 }
 0x235   :  { %v779_v37 = vpop.f32.mrf.mxu0  ;;  %v792_v29 = vpop.f32.mrf.mxu1 }
 0x236   :  { %v815_v40 = vadd.f32 %v779_v37, %v2233_v51  ;;  %v835_v58 = vadd.f32 %v792_v29, %v351_v23 }
 0x238   :  { %v1667_v32 = vmul.f32 -1.442695, %v815_v40  ;;  %v1668_v3 = vmul.f32 -1.442695, %v835_v58 }
 0x23a   :  { %1806 = vpow2.f32 %v1667_v32 }
 0x23b   :  { %1808 = vpow2.f32 %v1668_v3  ;;  %v380_v3 = vadd.f32 %v2287_v20, %v2248_v43 }
 0x23c   :  { %v805_v5 = vpop.f32.mrf.mxu2 }
 0x23d   :  { %v781_v12 = vpop.f32.mrf.mxu0  ;;  %v794_v16 = vpop.f32.mrf.mxu1  ;;  %v855_v40 = vadd.f32 %v2253_v46, %v805_v5 }
 0x240   :  { %v1807_v19 = vpop.eup %1806 }
 0x241   :  { %v1809_v22 = vpop.eup %1808  ;;  %v819_v25 = vadd.f32 1.0, %v1807_v19 }
 0x242   :  { %v839_v44 = vadd.f32 1.0, %v1809_v22 }
 0x243   :  { %1810 = vrcp.f32 %v819_v25  ;;  %v831_v63 = vand.u32 2147483648, %v819_v25  ;;  %v829_v31 = vand.u32 2147483647, %v819_v25  ;;  %vm825_vm1 = vweird.f32 %v819_v25 }
 0x244   :  { %1812 = vrcp.f32 %v839_v44  ;;  %v807_v39 = vpop.f32.mrf.mxu2  ;;  %v851_v12 = vand.u32 2147483648, %v839_v44  ;;  %vm845_vm5 = vweird.f32 %v839_v44  ;;  %v849_v19 = vand.u32 2147483647, %v839_v44 }
 0x245   :  { %v832_v37 = vor.u32 1.1754944e-38, %v831_v63  ;;  %vm830_vm3 = vcmp.eq.f32.partialorder %v829_v31, 8.507059e+37 }
 0x246   :  { %vm850_vm7 = vcmp.eq.f32.partialorder %v849_v19, 8.507059e+37 }
 0x249   :  { %v1811_v33 = vpop.eup %1810 }
 0x24a   :  { %v1813_v18 = vpop.eup %1812  ;;  %v821_v61 = vmul.f32 %v1811_v33, %v819_v25  ;;  %vm826_vm0 = vweird.f32 %v1811_v33  ;;  %v852_v25 = vor.u32 1.1754944e-38, %v851_v12 }
 0x24b   :  { %v841_v60 = vmul.f32 %v1813_v18, %v839_v44  ;;  %vm827_vm2 = vmor %vm825_vm1, %vm826_vm0  ;;  %vm846_vm4 = vweird.f32 %v1813_v18 }
 0x24c   :  { %v822_v51 = vsub.f32 1.0, %v821_v61  ;;  %vm847_vm6 = vmor %vm845_vm5, %vm846_vm4 }
 0x24d   :  { %v842_v21 = vsub.f32 1.0, %v841_v60 }
 0x24e   :  { %v823_v0 = vmul.f32 %v1811_v33, %v822_v51 }
 0x24f   :  { %v843_v6 = vmul.f32 %v1813_v18, %v842_v21 }
 0x250   :  { %v824_v23 = vadd.f32 %v1811_v33, %v823_v0 }
 0x251   :  { %v844_v32 = vadd.f32 %v1813_v18, %v843_v6 }
 0x252   :  { %v828_v29 = vsel %vm827_vm2, %v1811_v33, %v824_v23 }
 0x253   :  { %v833_v58 = vsel %vm830_vm3, %v832_v37, %v828_v29  ;;  %v848_v39 = vsel %vm847_vm6, %v1813_v18, %v844_v32 }
 0x254   :  { %v856_v16 = vmul.f32 %v855_v40, %v833_v58  ;;  %v853_v33 = vsel %vm850_vm7, %v852_v25, %v848_v39 }
 0x255   :  { %v859_v61 = vsub.f32 1.0, %v853_v33  ;;  %v861_v51 = vmul.f32 %v853_v33, %v2314_v4  ;;  %v353_v4 = vadd.f32 %v2289_v38, %v2237_v57 }
 0x256   :  { %v857_v22 = vadd.f32 %v856_v16, %v380_v3 }
 0x258   :  { %1814 = vtanh.f32 %v857_v22 }
 0x25e   :  { %v1815_v60 = vpop.eup %1814 }
 0x25f   :  { %v860_v5 = vmul.f32 %v1815_v60, %v859_v61 }
 0x261   :  { %v2349_v21 = vadd.f32 %v861_v51, %v860_v5 }
 0x263   :  { %v863_v20 = vpack.c.bf16 %v2349_v21, %v2349_v21 }
 0x265   :  { %872 = vmatmul.bf16.vlgmr.msrb.gmra.mxu3 %v863_v20  ;;  %885 = vmatmul.bf16.vlgmr.msrb.gmra.mxu0 %v863_v20 }
 0x266   :  { %898 = vmatmul.bf16.vlgmr.msrb.gmra.mxu1 %v863_v20  ;;  %1078 = vmatpush.bf16.msrb.mxu3 %v2110_v10 }
 0x267   :  { %1146 = vmatpush.bf16.msrb.mxu0 %v2087_v7  ;;  %1159 = vmatpush.bf16.msrb.mxu1 %v2112_v15 }
 0x26a   :  { %1079 = vmatpush.bf16.msrb.mxu3 %v2118_v26 }
 0x26b   :  { %1147 = vmatpush.bf16.msrb.mxu0 %v2090_v11  ;;  %1160 = vmatpush.bf16.msrb.mxu1 %v2121_v30 }
 0x26e   :  { %1080 = vmatpush.bf16.msrb.mxu3 %v2126_v42 }
 0x26f   :  { %1148 = vmatpush.bf16.msrb.mxu0 %v2093_v17  ;;  %1161 = vmatpush.bf16.msrb.mxu1 %v2129_v45 }
 0x272   :  { %1081 = vmatpush.bf16.msrb.mxu3 %v2132_v55 }
 0x273   :  { %1149 = vmatpush.bf16.msrb.mxu0 %v2096_v24  ;;  %1162 = vmatpush.bf16.msrb.mxu1 %v2135_v56 }
 0x276   :  { %1082 = vmatpush.bf16.msrb.mxu3 %v2138_v1 }
 0x277   :  { %1150 = vmatpush.bf16.msrb.mxu0 %v2099_v36  ;;  %1163 = vmatpush.bf16.msrb.mxu1 %v2142_v2 }
 0x27a   :  { %1083 = vmatpush.bf16.msrb.mxu3 %v2146_v13 }
 0x27b   :  { %1151 = vmatpush.bf16.msrb.mxu0 %v2102_v47  ;;  %1164 = vmatpush.bf16.msrb.mxu1 %v2150_v14 }
 0x27e   :  { %1084 = vmatpush.bf16.msrb.mxu3 %v2153_v27 }
 0x27f   :  { %1152 = vmatpush.bf16.msrb.mxu0 %v2105_v59  ;;  %1165 = vmatpush.bf16.msrb.mxu1 %v2157_v28 }
 0x282   :  { %1085 = vmatpush.bf16.msrb.mxu3 %v2162_v34 }
 0x283   :  { %1153 = vmatpush.bf16.msrb.mxu0 %v2108_v9  ;;  %1166 = vmatpush.bf16.msrb.mxu1 %v2165_v35 }
 0x2e2   :  { %v886_v44 = vpop.f32.mrf.mxu0 }
 0x2e3   :  { %v929_v18 = vadd.f32 %v886_v44, %v353_v4  ;;  %v899_v63 = vpop.f32.mrf.mxu1 }
 0x2e4   :  { %v949_v20 = vadd.f32 %v2253_v46, %v899_v63 }
 0x2e5   :  { %v1670_v0 = vmul.f32 -1.442695, %v929_v18 }
 0x2e7   :  { %1816 = vpow2.f32 %v1670_v0  ;;  %v382_v0 = vadd.f32 %v2291_v41, %v2248_v43 }
 0x2e8   :  { %v873_v31 = vpop.f32.mrf.mxu3 }
 0x2e9   :  { %v909_v6 = vadd.f32 %v873_v31, %v2235_v54 }
 0x2ea   :  { %v888_v23 = vpop.f32.mrf.mxu0 }
 0x2eb   :  { %v1669_v37 = vmul.f32 -1.442695, %v909_v6  ;;  %v901_v29 = vpop.f32.mrf.mxu1 }
 0x2ed   :  { %v1817_v40 = vpop.eup %1816  ;;  %1818 = vpow2.f32 %v1669_v37 }
 0x2ee   :  { %v933_v58 = vadd.f32 1.0, %v1817_v40 }
 0x2f0   :  { %v875_v32 = vpop.f32.mrf.mxu3  ;;  %1820 = vrcp.f32 %v933_v58  ;;  %v945_v31 = vand.u32 2147483648, %v933_v58  ;;  %vm939_vm13 = vweird.f32 %v933_v58  ;;  %v943_v23 = vand.u32 2147483647, %v933_v58 }
 0x2f2   :  { %v946_v40 = vor.u32 1.1754944e-38, %v945_v31  ;;  %vm944_vm15 = vcmp.eq.f32.partialorder %v943_v23, 8.507059e+37 }
 0x2f3   :  { %v1819_v3 = vpop.eup %1818 }
 0x2f4   :  { %v913_v12 = vadd.f32 1.0, %v1819_v3 }
 0x2f6   :  { %1822 = vrcp.f32 %v913_v12  ;;  %v1821_v38 = vpop.eup %1820  ;;  %v925_v33 = vand.u32 2147483648, %v913_v12  ;;  %v923_v54 = vand.u32 2147483647, %v913_v12  ;;  %vm919_vm9 = vweird.f32 %v913_v12 }
 0x2f7   :  { %v935_v16 = vmul.f32 %v1821_v38, %v933_v58  ;;  %vm940_vm12 = vweird.f32 %v1821_v38 }
 0x2f8   :  { %v926_v51 = vor.u32 1.1754944e-38, %v925_v33  ;;  %vm924_vm11 = vcmp.eq.f32.partialorder %v923_v54, 8.507059e+37  ;;  %vm941_vm14 = vmor %vm939_vm13, %vm940_vm12 }
 0x2f9   :  { %v936_v39 = vsub.f32 1.0, %v935_v16 }
 0x2fb   :  { %v937_v60 = vmul.f32 %v1821_v38, %v936_v39 }
 0x2fc   :  { %v1823_v19 = vpop.eup %1822 }
 0x2fd   :  { %v915_v22 = vmul.f32 %v1823_v19, %v913_v12  ;;  %vm920_vm8 = vweird.f32 %v1823_v19  ;;  %v938_v18 = vadd.f32 %v1821_v38, %v937_v60 }
 0x2fe   :  { %vm921_vm10 = vmor %vm919_vm9, %vm920_vm8 }
 0x2ff   :  { %v916_v25 = vsub.f32 1.0, %v915_v22  ;;  %v942_v29 = vsel %vm941_vm14, %v1821_v38, %v938_v18 }
 0x300   :  { %v947_v32 = vsel %vm944_vm15, %v946_v40, %v942_v29 }
 0x301   :  { %v917_v61 = vmul.f32 %v1823_v19, %v916_v25  ;;  %v953_v63 = vsub.f32 1.0, %v947_v32  ;;  %v955_v16 = vmul.f32 %v947_v32, %v2349_v21 }
 0x303   :  { %v918_v5 = vadd.f32 %v1823_v19, %v917_v61 }
 0x305   :  { %v922_v4 = vsel %vm921_vm10, %v1823_v19, %v918_v5 }
 0x306   :  { %v927_v44 = vsel %vm924_vm11, %v926_v51, %v922_v4  ;;  %v385_v4 = vadd.f32 %v2295_v49, %v2248_v43 }
 0x307   :  { %v950_v6 = vmul.f32 %v949_v20, %v927_v44 }
 0x309   :  { %v951_v37 = vadd.f32 %v950_v6, %v382_v0 }
 0x30b   :  { %1824 = vtanh.f32 %v951_v37 }
 0x311   :  { %v1825_v3 = vpop.eup %1824 }
 0x312   :  { %v954_v12 = vmul.f32 %v1825_v3, %v953_v63 }
 0x314   :  { %v2384_v19 = vadd.f32 %v955_v16, %v954_v12 }
 0x316   :  { %v957_v41 = vpack.c.bf16 %v2384_v19, %v2384_v19 }
 0x318   :  { %966 = vmatmul.bf16.vlgmr.msrb.gmra.mxu2 %v957_v41  ;;  %979 = vmatmul.bf16.vlgmr.msra.gmra.mxu3 %v957_v41 }
 0x319   :  { %992 = vmatmul.bf16.vlgmr.msra.gmra.mxu0 %v957_v41  ;;  %1172 = vmatpush.bf16.msrb.mxu2 %v2110_v10 }
 0x31a   :  { %1240 = vmatpush.bf16.msra.mxu3 %v2087_v7  ;;  %1253 = vmatpush.bf16.msra.mxu0 %v2112_v15 }
 0x31d   :  { %1173 = vmatpush.bf16.msrb.mxu2 %v2118_v26 }
 0x31e   :  { %1241 = vmatpush.bf16.msra.mxu3 %v2090_v11  ;;  %1254 = vmatpush.bf16.msra.mxu0 %v2121_v30  ;;  %v356_v11 = vadd.f32 %v2293_v48, %v2237_v57 }
 0x321   :  { %1174 = vmatpush.bf16.msrb.mxu2 %v2126_v42 }
 0x322   :  { %1242 = vmatpush.bf16.msra.mxu3 %v2093_v17  ;;  %1255 = vmatpush.bf16.msra.mxu0 %v2129_v45 }
 0x325   :  { %1175 = vmatpush.bf16.msrb.mxu2 %v2132_v55 }
 0x326   :  { %1243 = vmatpush.bf16.msra.mxu3 %v2096_v24  ;;  %1256 = vmatpush.bf16.msra.mxu0 %v2135_v56 }
 0x329   :  { %1176 = vmatpush.bf16.msrb.mxu2 %v2138_v1 }
 0x32a   :  { %1244 = vmatpush.bf16.msra.mxu3 %v2099_v36  ;;  %1257 = vmatpush.bf16.msra.mxu0 %v2142_v2 }
 0x32d   :  { %1177 = vmatpush.bf16.msrb.mxu2 %v2146_v13 }
 0x32e   :  { %1245 = vmatpush.bf16.msra.mxu3 %v2102_v47  ;;  %1258 = vmatpush.bf16.msra.mxu0 %v2150_v14 }
 0x331   :  { %1178 = vmatpush.bf16.msrb.mxu2 %v2153_v27 }
 0x332   :  { %1246 = vmatpush.bf16.msra.mxu3 %v2105_v59  ;;  %1259 = vmatpush.bf16.msra.mxu0 %v2157_v28 }
 0x335   :  { %1179 = vmatpush.bf16.msrb.mxu2 %v2162_v34 }
 0x336   :  { %1247 = vmatpush.bf16.msra.mxu3 %v2108_v9  ;;  %1260 = vmatpush.bf16.msra.mxu0 %v2165_v35 }
 0x396   :  { %v993_v7 = vpop.f32.mrf.mxu0 }
 0x397   :  { %v1043_v60 = vadd.f32 %v2253_v46, %v993_v7 }
 0x39b   :  { %v967_v17 = vpop.f32.mrf.mxu2  ;;  %v980_v24 = vpop.f32.mrf.mxu3 }
 0x39c   :  { %v1003_v36 = vadd.f32 %v967_v17, %v2239_v62  ;;  %v1023_v47 = vadd.f32 %v980_v24, %v356_v11 }
 0x39e   :  { %v1671_v15 = vmul.f32 -1.442695, %v1003_v36  ;;  %v1672_v30 = vmul.f32 -1.442695, %v1023_v47  ;;  %v995_v59 = vpop.f32.mrf.mxu0 }
 0x3a0   :  { %1826 = vpow2.f32 %v1671_v15 }
 0x3a1   :  { %1828 = vpow2.f32 %v1672_v30 }
 0x3a3   :  { %v969_v45 = vpop.f32.mrf.mxu2  ;;  %v982_v56 = vpop.f32.mrf.mxu3 }
 0x3a6   :  { %v1827_v2 = vpop.eup %1826 }
 0x3a7   :  { %v1829_v9 = vpop.eup %1828  ;;  %v1007_v14 = vadd.f32 1.0, %v1827_v2 }
 0x3a8   :  { %v1027_v28 = vadd.f32 1.0, %v1829_v9 }
 0x3a9   :  { %1830 = vrcp.f32 %v1007_v14  ;;  %v1019_v62 = vand.u32 2147483648, %v1007_v14  ;;  %v1017_v25 = vand.u32 2147483647, %v1007_v14  ;;  %vm1013_vm1 = vweird.f32 %v1007_v14 }
 0x3aa   :  { %1832 = vrcp.f32 %v1027_v28  ;;  %v1039_v18 = vand.u32 2147483648, %v1027_v28  ;;  %vm1033_vm5 = vweird.f32 %v1027_v28  ;;  %v1037_v0 = vand.u32 2147483647, %v1027_v28 }
 0x3ab   :  { %v1020_v54 = vor.u32 1.1754944e-38, %v1019_v62  ;;  %vm1018_vm3 = vcmp.eq.f32.partialorder %v1017_v25, 8.507059e+37 }
 0x3ac   :  { %v1040_v23 = vor.u32 1.1754944e-38, %v1039_v18  ;;  %vm1038_vm7 = vcmp.eq.f32.partialorder %v1037_v0, 8.507059e+37  ;;  %v2476_v18 = vld [vmem:[#allocation23_spill] sm:$0xff] }
 0x3af   :  { %v1831_v35 = vpop.eup %1830 }
 0x3b0   :  { %v1833_v48 = vpop.eup %1832  ;;  %v1009_v21 = vmul.f32 %v1831_v35, %v1007_v14  ;;  %vm1014_vm0 = vweird.f32 %v1831_v35 }
 0x3b1   :  { %v1029_v58 = vmul.f32 %v1833_v48, %v1027_v28  ;;  %vm1015_vm2 = vmor %vm1013_vm1, %vm1014_vm0  ;;  %vm1034_vm4 = vweird.f32 %v1833_v48  ;;  %v387_v28 = vadd.f32 %v2299_v52, %v2248_v43 }
 0x3b2   :  { %v1010_v38 = vsub.f32 1.0, %v1009_v21  ;;  %vm1035_vm6 = vmor %vm1033_vm5, %vm1034_vm4 }
 0x3b3   :  { %v1030_v22 = vsub.f32 1.0, %v1029_v58 }
 0x3b4   :  { %v1011_v39 = vmul.f32 %v1831_v35, %v1010_v38 }
 0x3b5   :  { %v1031_v33 = vmul.f32 %v1833_v48, %v1030_v22 }
 0x3b6   :  { %v1012_v61 = vadd.f32 %v1831_v35, %v1011_v39 }
 0x3b7   :  { %v1032_v20 = vadd.f32 %v1833_v48, %v1031_v33 }
 0x3b8   :  { %v1016_v5 = vsel %vm1015_vm2, %v1831_v35, %v1012_v61 }
 0x3b9   :  { %v1021_v51 = vsel %vm1018_vm3, %v1020_v54, %v1016_v5  ;;  %v1036_v6 = vsel %vm1035_vm6, %v1833_v48, %v1032_v20  ;;  %v361_v20 = vadd.f32 %v2301_v53, %v2237_v57 }
 0x3ba   :  { %v1044_v44 = vmul.f32 %v1043_v60, %v1021_v51  ;;  %v1041_v37 = vsel %vm1038_vm7, %v1040_v23, %v1036_v6 }
 0x3bb   :  { %v1047_v29 = vsub.f32 1.0, %v1041_v37  ;;  %v1049_v63 = vmul.f32 %v1041_v37, %v2384_v19 }
 0x3bc   :  { %v1045_v31 = vadd.f32 %v1044_v44, %v385_v4 }
 0x3be   :  { %1834 = vtanh.f32 %v1045_v31 }
 0x3c4   :  { %v1835_v40 = vpop.eup %1834 }
 0x3c5   :  { %v1048_v32 = vmul.f32 %v1835_v40, %v1047_v29 }
 0x3c7   :  { %v2419_v3 = vadd.f32 %v1049_v63, %v1048_v32 }
 0x3c9   :  { %v1051_v49 = vpack.c.bf16 %v2419_v3, %v2419_v3 }
 0x3cb   :  { %1060 = vmatmul.bf16.vlgmr.msra.gmra.mxu1 %v1051_v49  ;;  %1073 = vmatmul.bf16.vlgmr.msra.gmra.mxu2 %v1051_v49 }
 0x3cc   :  { %1086 = vmatmul.bf16.vlgmr.msrb.gmra.mxu3 %v1051_v49  ;;  %1266 = vmatpush.bf16.msra.mxu1 %v2110_v10  ;;  %v358_v10 = vadd.f32 %v2297_v50, %v2237_v57 }
 0x3d0   :  { %1267 = vmatpush.bf16.msra.mxu1 %v2118_v26 }
 0x3d4   :  { %1268 = vmatpush.bf16.msra.mxu1 %v2126_v42 }
 0x3d8   :  { %1269 = vmatpush.bf16.msra.mxu1 %v2132_v55 }
 0x3dc   :  { %1270 = vmatpush.bf16.msra.mxu1 %v2138_v1 }
 0x3e0   :  { %1271 = vmatpush.bf16.msra.mxu1 %v2146_v13 }
 0x3e4   :  { %1272 = vmatpush.bf16.msra.mxu1 %v2153_v27 }
 0x3e8   :  { %1273 = vmatpush.bf16.msra.mxu1 %v2162_v34 }
 0x448   :  { %v1061_v12 = vpop.f32.mrf.mxu1 }
 0x449   :  { %v1097_v16 = vadd.f32 %v1061_v12, %v2242_v8 }
 0x44b   :  { %v1673_v19 = vmul.f32 -1.442695, %v1097_v16 }
 0x44d   :  { %1836 = vpow2.f32 %v1673_v19 }
 0x44e   :  { %v1074_v26 = vpop.f32.mrf.mxu2 }
 0x44f   :  { %v1117_v42 = vadd.f32 %v1074_v26, %v358_v10  ;;  %v1087_v41 = vpop.f32.mrf.mxu3 }
 0x450   :  { %v1063_v55 = vpop.f32.mrf.mxu1  ;;  %v1137_v14 = vadd.f32 %v2253_v46, %v1087_v41 }
 0x451   :  { %v1674_v7 = vmul.f32 -1.442695, %v1117_v42 }
 0x453   :  { %v1837_v1 = vpop.eup %1836  ;;  %1838 = vpow2.f32 %v1674_v7 }
 0x454   :  { %v1101_v13 = vadd.f32 1.0, %v1837_v1 }
 0x456   :  { %1840 = vrcp.f32 %v1101_v13  ;;  %v1076_v27 = vpop.f32.mrf.mxu2  ;;  %v1113_v47 = vand.u32 2147483648, %v1101_v13  ;;  %v1111_v15 = vand.u32 2147483647, %v1101_v13  ;;  %vm1107_vm9 = vweird.f32 %v1101_v13 }
 0x457   :  { %v1089_v11 = vpop.f32.mrf.mxu3 }
 0x458   :  { %v1114_v56 = vor.u32 1.1754944e-38, %v1113_v47  ;;  %vm1112_vm11 = vcmp.eq.f32.partialorder %v1111_v15, 8.507059e+37 }
 0x459   :  { %v1839_v34 = vpop.eup %1838 }
 0x45a   :  { %v1121_v17 = vadd.f32 1.0, %v1839_v34 }
 0x45c   :  { %v1841_v24 = vpop.eup %1840  ;;  %1842 = vrcp.f32 %v1121_v17  ;;  %v1133_v21 = vand.u32 2147483648, %v1121_v17  ;;  %v1131_v38 = vand.u32 2147483647, %v1121_v17  ;;  %vm1127_vm13 = vweird.f32 %v1121_v17 }
 0x45d   :  { %v1103_v8 = vmul.f32 %v1841_v24, %v1101_v13  ;;  %vm1108_vm8 = vweird.f32 %v1841_v24 }
 0x45e   :  { %vm1109_vm10 = vmor %vm1107_vm9, %vm1108_vm8  ;;  %v1134_v39 = vor.u32 1.1754944e-38, %v1133_v21  ;;  %vm1132_vm15 = vcmp.eq.f32.partialorder %v1131_v38, 8.507059e+37  ;;  %v1771_v21 = vld [vmem:[#allocation11 + $0x30] sm:$0xff] }
 0x45f   :  { %v1104_v36 = vsub.f32 1.0, %v1103_v8  ;;  %v2477_v8 = vld [vmem:[#allocation25_spill] sm:$0xff] }
 0x461   :  { %v1105_v50 = vmul.f32 %v1841_v24, %v1104_v36  ;;  %v390_v36 = vadd.f32 %v2477_v8, %v2248_v43 }
 0x462   :  { %v1843_v30 = vpop.eup %1842 }
 0x463   :  { %v1123_v59 = vmul.f32 %v1843_v30, %v1121_v17  ;;  %v1106_v45 = vadd.f32 %v1841_v24, %v1105_v50  ;;  %vm1128_vm12 = vweird.f32 %v1843_v30 }
 0x464   :  { %vm1129_vm14 = vmor %vm1127_vm13, %vm1128_vm12 }
 0x465   :  { %v1124_v2 = vsub.f32 1.0, %v1123_v59  ;;  %v1110_v9 = vsel %vm1109_vm10, %v1841_v24, %v1106_v45 }
 0x466   :  { %v1115_v35 = vsel %vm1112_vm11, %v1114_v56, %v1110_v9 }
 0x467   :  { %v1125_v48 = vmul.f32 %v1843_v30, %v1124_v2  ;;  %v1138_v58 = vmul.f32 %v1137_v14, %v1115_v35 }
 0x469   :  { %v1139_v62 = vadd.f32 %v1138_v58, %v387_v28  ;;  %v1126_v22 = vadd.f32 %v1843_v30, %v1125_v48  ;;  %v1772_v48 = vld [vmem:[#allocation11 + $0x38] sm:$0xff]  ;;  %v2478_v58 = vld [vmem:[#allocation26_spill] sm:$0xff] }
 0x46a   :  { %1402 = vmatpush.bf16.msra.mxu2 %v1772_v48  ;;  %v363_v38 = vadd.f32 %v2478_v58, %v2237_v57 }
 0x46b   :  { %1844 = vtanh.f32 %v1139_v62  ;;  %v1130_v25 = vsel %vm1129_vm14, %v1843_v30, %v1126_v22  ;;  %v1770_v62 = vld [vmem:[#allocation11 + $0x28] sm:$0xff] }
 0x46c   :  { %v1135_v33 = vsel %vm1132_vm15, %v1134_v39, %v1130_v25 }
 0x46d   :  { %v1141_v61 = vsub.f32 1.0, %v1135_v33  ;;  %v1143_v52 = vmul.f32 %v1135_v33, %v2419_v3 }
 0x46e   :  { %1403 = vmatpush.bf16.msra.mxu2 %v1771_v21 }
 0x471   :  { %v1845_v54 = vpop.eup %1844 }
 0x472   :  { %v1142_v60 = vmul.f32 %v1845_v54, %v1141_v61  ;;  %1404 = vmatpush.bf16.msra.mxu2 %v1770_v62  ;;  %v1769_v61 = vld [vmem:[#allocation11 + $0x20] sm:$0xff]  ;;  %v1768_v54 = vld [vmem:[#allocation11 + $0x18] sm:$0xff] }
 0x474   :  { %v1144_v5 = vadd.f32 %v1143_v52, %v1142_v60  ;;  %v2479_v52 = vld [vmem:[#allocation24_spill] sm:$0xff] }
 0x476   :  { %v1145_v51 = vpack.c.bf16 %v1144_v5, %v1144_v5  ;;  %1405 = vmatpush.bf16.msra.mxu2 %v1769_v61 }
 0x478   :  { %1154 = vmatmul.bf16.vlgmr.msrb.gmra.mxu0 %v1145_v51  ;;  %1167 = vmatmul.bf16.vlgmr.msrb.gmra.mxu1 %v1145_v51 }
 0x479   :  { %1180 = vmatmul.bf16.vlgmr.msrb.gmra.mxu2 %v1145_v51 }
 0x47a   :  { %1406 = vmatpush.bf16.msra.mxu2 %v1768_v54 }
 0x4f5   :  { %v1155_v4 = vpop.f32.mrf.mxu0  ;;  %v1168_v44 = vpop.f32.mrf.mxu1 }
 0x4f6   :  { %v1191_v0 = vadd.f32 %v1155_v4, %v2476_v18  ;;  %v1211_v31 = vadd.f32 %v1168_v44, %v361_v20  ;;  %v1767_v44 = vld [vmem:[#allocation11 + $0x10] sm:$0xff] }
 0x4f7   :  { %1407 = vmatpush.bf16.msra.mxu2 %v1767_v44 }
 0x4f8   :  { %v1675_v6 = vmul.f32 -1.442695, %v1191_v0  ;;  %v1676_v23 = vmul.f32 -1.442695, %v1211_v31  ;;  %v1766_v0 = vld [vmem:[#allocation11 + $0x8] sm:$0xff] }
 0x4fa   :  { %1846 = vpow2.f32 %v1675_v6 }
 0x4fb   :  { %1848 = vpow2.f32 %v1676_v23  ;;  %1408 = vmatpush.bf16.msra.mxu2 %v1766_v0  ;;  %v1765_v23 = vld [vmem:[#allocation11] sm:$0xff] }
 0x4fc   :  { %v1181_v37 = vpop.f32.mrf.mxu2 }
 0x4fd   :  { %v1157_v29 = vpop.f32.mrf.mxu0  ;;  %v1170_v40 = vpop.f32.mrf.mxu1  ;;  %v1231_v34 = vadd.f32 %v2253_v46, %v1181_v37 }
 0x4ff   :  { %1409 = vmatpush.bf16.msra.mxu2 %v1765_v23 }
 0x500   :  { %v1847_v32 = vpop.eup %1846 }
 0x501   :  { %v1849_v63 = vpop.eup %1848  ;;  %v1195_v3 = vadd.f32 1.0, %v1847_v32 }
 0x502   :  { %v1215_v49 = vadd.f32 1.0, %v1849_v63 }
 0x503   :  { %1850 = vrcp.f32 %v1195_v3  ;;  %v1207_v41 = vand.u32 2147483648, %v1195_v3  ;;  %v1205_v7 = vand.u32 2147483647, %v1195_v3  ;;  %vm1201_vm1 = vweird.f32 %v1195_v3 }
 0x504   :  { %1852 = vrcp.f32 %v1215_v49  ;;  %v1183_v12 = vpop.f32.mrf.mxu2  ;;  %v1227_v47 = vand.u32 2147483648, %v1215_v49  ;;  %vm1221_vm5 = vweird.f32 %v1215_v49  ;;  %v1225_v15 = vand.u32 2147483647, %v1215_v49 }
 0x505   :  { %v1208_v27 = vor.u32 1.1754944e-38, %v1207_v41  ;;  %vm1206_vm3 = vcmp.eq.f32.partialorder %v1205_v7, 8.507059e+37 }
 0x506   :  { %v1228_v45 = vor.u32 1.1754944e-38, %v1227_v47  ;;  %vm1226_vm7 = vcmp.eq.f32.partialorder %v1225_v15, 8.507059e+37 }
 0x509   :  { %v1851_v53 = vpop.eup %1850 }
 0x50a   :  { %v1853_v16 = vpop.eup %1852  ;;  %v1197_v19 = vmul.f32 %v1851_v53, %v1195_v3  ;;  %vm1202_vm0 = vweird.f32 %v1851_v53 }
 0x50b   :  { %v1217_v10 = vmul.f32 %v1853_v16, %v1215_v49  ;;  %vm1203_vm2 = vmor %vm1201_vm1, %vm1202_vm0  ;;  %vm1222_vm4 = vweird.f32 %v1853_v16 }
 0x50c   :  { %v1198_v26 = vsub.f32 1.0, %v1197_v19  ;;  %vm1223_vm6 = vmor %vm1221_vm5, %vm1222_vm4 }
 0x50d   :  { %v1218_v42 = vsub.f32 1.0, %v1217_v10 }
 0x50e   :  { %v1199_v55 = vmul.f32 %v1851_v53, %v1198_v26 }
 0x50f   :  { %v1219_v1 = vmul.f32 %v1853_v16, %v1218_v42  ;;  %v1866_v42 = vld [vmem:[%s2467_s4] ss:$0 sm:$0xff] }
 0x510   :  { %v1200_v13 = vadd.f32 %v1851_v53, %v1199_v55 }
 0x511   :  { %v1220_v24 = vadd.f32 %v1853_v16, %v1219_v1 }
 0x512   :  { %v1204_v11 = vsel %vm1203_vm2, %v1851_v53, %v1200_v13  ;;  %v2480_v13 = vld [vmem:[#allocation27_spill] sm:$0xff] }
 0x513   :  { %v1209_v17 = vsel %vm1206_vm3, %v1208_v27, %v1204_v11  ;;  %v1224_v59 = vsel %vm1223_vm6, %v1853_v16, %v1220_v24  ;;  %v392_v27 = vadd.f32 %v2480_v13, %v2248_v43  ;;  %v1785_v43 = vld [vmem:[%s2469_s6] ss:$0 sm:$0xff] }
 0x514   :  { %v1232_v50 = vmul.f32 %v1231_v34, %v1209_v17  ;;  %v1229_v56 = vsel %vm1226_vm7, %v1228_v45, %v1224_v59 }
 0x515   :  { %v1235_v2 = vsub.f32 1.0, %v1229_v56  ;;  %v1237_v14 = vmul.f32 %v1229_v56, %v1144_v5 }
 0x516   :  { %v1233_v30 = vadd.f32 %v1232_v50, %v390_v36 }
 0x518   :  { %1854 = vtanh.f32 %v1233_v30 }
 0x51e   :  { %v1855_v9 = vpop.eup %1854 }
 0x51f   :  { %v1236_v46 = vmul.f32 %v1855_v9, %v1235_v2 }
 0x521   :  { %v2444_v28 = vadd.f32 %v1237_v14, %v1236_v46 }
 0x523   :  { %v1239_v35 = vpack.c.bf16 %v2444_v28, %v2444_v28 }
 0x525   :  { %1248 = vmatmul.bf16.vlgmr.msra.gmra.mxu3 %v1239_v35  ;;  %1261 = vmatmul.bf16.vlgmr.msra.gmra.mxu0 %v1239_v35 }
 0x526   :  { %1274 = vmatmul.bf16.vlgmr.msra.gmra.mxu1 %v1239_v35 }
 0x5a2   :  { %v1262_v22 = vpop.f32.mrf.mxu0 }
 0x5a3   :  { %v1305_v39 = vadd.f32 %v1262_v22, %v363_v38  ;;  %v1275_v25 = vpop.f32.mrf.mxu1 }
 0x5a4   :  { %v1325_v41 = vadd.f32 %v1866_v42, %v1275_v25 }
 0x5a5   :  { %v1678_v33 = vmul.f32 -1.442695, %v1305_v39 }
 0x5a7   :  { %1856 = vpow2.f32 %v1678_v33 }
 0x5a8   :  { %v1249_v60 = vpop.f32.mrf.mxu3 }
 0x5a9   :  { %v1285_v5 = vadd.f32 %v1249_v60, %v2479_v52 }
 0x5aa   :  { %v1264_v51 = vpop.f32.mrf.mxu0 }
 0x5ab   :  { %v1677_v20 = vmul.f32 -1.442695, %v1285_v5  ;;  %v1277_v4 = vpop.f32.mrf.mxu1 }
 0x5ad   :  { %v1857_v18 = vpop.eup %1856  ;;  %1858 = vpow2.f32 %v1677_v20 }
 0x5ae   :  { %v1309_v57 = vadd.f32 1.0, %v1857_v18 }
 0x5b0   :  { %v1251_v31 = vpop.f32.mrf.mxu3  ;;  %1860 = vrcp.f32 %v1309_v57  ;;  %v1321_v11 = vand.u32 2147483648, %v1309_v57  ;;  %vm1315_vm13 = vweird.f32 %v1309_v57  ;;  %v1319_v17 = vand.u32 2147483647, %v1309_v57 }
 0x5b2   :  { %v1322_v36 = vor.u32 1.1754944e-38, %v1321_v11  ;;  %vm1320_vm15 = vcmp.eq.f32.partialorder %v1319_v17, 8.507059e+37 }
 0x5b3   :  { %v1859_v6 = vpop.eup %1858 }
 0x5b4   :  { %v1289_v37 = vadd.f32 1.0, %v1859_v6 }
 0x5b6   :  { %1862 = vrcp.f32 %v1289_v37  ;;  %v1861_v29 = vpop.eup %1860  ;;  %v1301_v12 = vand.u32 2147483648, %v1289_v37  ;;  %v1299_v16 = vand.u32 2147483647, %v1289_v37  ;;  %vm1295_vm9 = vweird.f32 %v1289_v37 }
 0x5b7   :  { %v1311_v40 = vmul.f32 %v1861_v29, %v1309_v57  ;;  %vm1316_vm12 = vweird.f32 %v1861_v29 }
 0x5b8   :  { %v1302_v26 = vor.u32 1.1754944e-38, %v1301_v12  ;;  %vm1300_vm11 = vcmp.eq.f32.partialorder %v1299_v16, 8.507059e+37  ;;  %vm1317_vm14 = vmor %vm1315_vm13, %vm1316_vm12 }
 0x5b9   :  { %v1312_v3 = vsub.f32 1.0, %v1311_v40 }
 0x5bb   :  { %v1313_v19 = vmul.f32 %v1861_v29, %v1312_v3 }
 0x5bc   :  { %v1863_v32 = vpop.eup %1862 }
 0x5bd   :  { %v1291_v63 = vmul.f32 %v1863_v32, %v1289_v37  ;;  %vm1296_vm8 = vweird.f32 %v1863_v32  ;;  %v1314_v1 = vadd.f32 %v1861_v29, %v1313_v19 }
 0x5be   :  { %vm1297_vm10 = vmor %vm1295_vm9, %vm1296_vm8 }
 0x5bf   :  { %v1292_v49 = vsub.f32 1.0, %v1291_v63  ;;  %v1318_v8 = vsel %vm1317_vm14, %v1861_v29, %v1314_v1 }
 0x5c0   :  { %v1323_v47 = vsel %vm1320_vm15, %v1322_v36, %v1318_v8 }
 0x5c1   :  { %v1293_v53 = vmul.f32 %v1863_v32, %v1292_v49  ;;  %v1329_v50 = vsub.f32 1.0, %v1323_v47  ;;  %v1331_v59 = vmul.f32 %v1323_v47, %v2444_v28 }
 0x5c3   :  { %v1294_v10 = vadd.f32 %v1863_v32, %v1293_v53 }
 0x5c5   :  { %v1298_v55 = vsel %vm1297_vm10, %v1863_v32, %v1294_v10 }
 0x5c6   :  { %v1303_v7 = vsel %vm1300_vm11, %v1302_v26, %v1298_v55 }
 0x5c7   :  { %v1326_v34 = vmul.f32 %v1325_v41, %v1303_v7 }
 0x5c9   :  { %v1327_v24 = vadd.f32 %v1326_v34, %v392_v27 }
 0x5cb   :  { %1864 = vtanh.f32 %v1327_v24 }
 0x5d1   :  { %v1865_v15 = vpop.eup %1864 }
 0x5d2   :  { %v1330_v30 = vmul.f32 %v1865_v15, %v1329_v50 }
 0x5d4   :  { %v1332_v45 = vadd.f32 %v1331_v59, %v1330_v30 }
 0x5d6   :  { %v1333_v56 = vpack.c.bf16 %v1332_v45, %v1332_v45 }
 0x5d8   :  { %1410 = vmatmul.bf16.vlgmr.msra.gmra.mxu2 %v1333_v56 }
 0x65b   :  { %v1411_v2 = vpop.f32.mrf.mxu2 }
 0x65c   :  { %v1412_v9 = vadd.f32 %v1785_v43, %v1411_v2 }
 0x65e   :  { %1415 = vst [vmem:[#allocation13] sm:$0xff] %v1412_v9 }
 0x65f   :  { %1426 = dma.vmem_to_hbm [thread:$0]  %s1422_s8, 128, %s1424_s11, [#allocation7]  }
 0x663   :  { %v1413_v46 = vpop.f32.mrf.mxu2 }
 0x664   :  { %2019 = dma.done.wait [#allocation7], 128  }
 0x665   :  { %2020 = vsyncadd [#allocation7], 4294967168 }
 0x666   :  { %1431 = vsyncpa [#allocation6], 1 }
 0x667   :  { %1432 = vsyncpa [#allocation9], 1 }
 0x668   :  { %1433 = vsyncpa [#allocation12], 1 }
 0x669   :  { %1434 = vsyncpa [#allocation7], 1 }
 0x66a   :  { %1435 = vsyncmov [#allocation4] }
 0x66d   :  { %s1436_s6 = vpop.sfrf %1435 }
 0x66e   :  { %p1711_p0 = scmp.ne.s32.totalorder %s1436_s6, 0 }
 0x670   :  { %1440 = shalt.err (%p1711_p0)  }
 0x671   :  { %1442 = vsyncmov [#allocation4 + $0x1] }
 0x674   :  { %s1443_s12 = vpop.sfrf %1442 }
 0x675   :  { %p1712_p1 = scmp.ne.s32.totalorder %s1443_s12, 0 }
 0x677   :  { %1447 = shalt.err (%p1712_p1)  }

</bundles_post_ra>
